<compile_context>
chip_gen: v7x
topology: tpu7x:2x2x1
jax: 0.10.0
libtpu: 0.0.40
codegen_flags: <defaults>
</compile_context>

<pallas_src>
import functools

import numpy as np
import jax
import jax.numpy as jnp
from jax import lax
from jax.experimental import pallas as pl
from jax.experimental.pallas import tpu as pltpu

EPS = 1e-5  # nn.BatchNorm2d default eps

# Set to jnp.bfloat16 on v6e/v7x to halve matmul-operand DMA/VMEM bytes and hit
# the fast MXU path (accumulation stays f32 via preferred_element_type).  Kept
# at f32 in this correctness script because the e4 BatchNorm sees only
# M = batch = 2 samples per channel (near-degenerate variance) and amplifies
# bf16 rounding beyond the test tolerance.
MATMUL_DTYPE = jnp.float32


# ----------------------------------------------------------------------------
# Pallas kernel: fused conv-as-matmul + batchnorm (batch stats) + activation
# ----------------------------------------------------------------------------
def _fused_conv_bn_act_kernel(w_ref, p_ref, gb_ref, o_ref, *, act):
    # w_ref: (Cout, K), p_ref: (K, M), gb_ref: (Cout, 2) = [gamma | beta]
    # o_ref: (Cout, M)  -- M = N*Ho*Wo sits in the lane dimension (lane-dense).
    acc = jnp.dot(w_ref[...], p_ref[...], preferred_element_type=jnp.float32)

    inv_m = 1.0 / acc.shape[1]
    mean = jnp.sum(acc, axis=1, keepdims=True) * inv_m                 # (Cout,1)
    centered = acc - mean
    var = jnp.sum(centered * centered, axis=1, keepdims=True) * inv_m  # biased
    gamma = gb_ref[:, 0:1]
    beta = gb_ref[:, 1:2]
    scale = gamma * lax.rsqrt(var + EPS)                               # (Cout,1)
    y = centered * scale + beta                                        # 1 mul + 1 add on (C,M)

    if act == "relu":
        y = jnp.maximum(y, 0.0)
    else:  # sigmoid; divide goes to the otherwise-idle EUP slot
        y = pl.reciprocal(1.0 + jnp.exp(-y), approx=True)
    o_ref[...] = y


def _fused_layer(patches_km, w_oihw, gamma, beta, *, act):
    """pallas_call wrapper: patches (K,M) + torch-layout weight -> (Cout, M)."""
    Cout, Cin, kh, kw = w_oihw.shape
    K, M = patches_km.shape
    assert K == Cin * kh * kw
    # Patch K-ordering is (kh, kw, Cin) with Cin fastest -> match the weight.
    w2 = jnp.transpose(w_oihw, (0, 2, 3, 1)).reshape(Cout, K)
    gb = jnp.stack([gamma, beta], axis=1)                               # (Cout, 2)

    w2 = w2.astype(MATMUL_DTYPE)
    patches_km = patches_km.astype(MATMUL_DTYPE)

    return pl.pallas_call(
        functools.partial(_fused_conv_bn_act_kernel, act=act),
        out_shape=jax.ShapeDtypeStruct((Cout, M), jnp.float32),
        grid=(1,),  # whole layer fits trivially in VMEM at these sizes
        in_specs=[
            pl.BlockSpec((Cout, K), lambda i: (0, 0)),
            pl.BlockSpec((K, M), lambda i: (0, 0)),
            pl.BlockSpec((Cout, 2), lambda i: (0, 0)),
        ],
        out_specs=pl.BlockSpec((Cout, M), lambda i: (0, 0)),
        compiler_params=pltpu.CompilerParams(
            dimension_semantics=("arbitrary",)),
    )(w2, patches_km, gb)


# ----------------------------------------------------------------------------
# Glue: patch extraction on (C, N, H, W) activations (slicing/gather only)
# ----------------------------------------------------------------------------
def _im2col_cm(x_cnhw, kh, kw, stride, pad):
    """im2col producing (K, M) with K ordered (kh, kw, C), M = N*Ho*Wo."""
    if pad:
        x_cnhw = jnp.pad(x_cnhw, ((0, 0), (0, 0), (pad, pad), (pad, pad)))
    C, N, H, W = x_cnhw.shape
    Ho = (H - kh) // stride + 1
    Wo = (W - kw) // stride + 1
    cols = []
    for i in range(kh):
        for j in range(kw):
            cols.append(
                x_cnhw[:, :, i:i + stride * Ho:stride, j:j + stride * Wo:stride])
    patches = jnp.concatenate(cols, axis=0).reshape(kh * kw * C, N * Ho * Wo)
    return patches, N, Ho, Wo


def _im2col_upsample2_cm(x_cnhw, kh, kw):
    """Fused nearest-neighbor 2x upsample + im2col (stride 1, no padding).

    Builds the patches of conv(upsample2(x)) directly from x with static
    floor-divide gather indices: up[h] == x[h // 2], so patch element i at
    output row ho reads x[(ho + i) // 2].  The 4x upsampled tensor is never
    materialized in HBM.
    """
    C, N, H, W = x_cnhw.shape
    Ho = 2 * H - kh + 1
    Wo = 2 * W - kw + 1
    cols = []
    for i in range(kh):
        idx_h = (np.arange(Ho) + i) // 2
        xi = jnp.take(x_cnhw, idx_h, axis=2)
        for j in range(kw):
            idx_w = (np.arange(Wo) + j) // 2
            cols.append(jnp.take(xi, idx_w, axis=3))
    patches = jnp.concatenate(cols, axis=0).reshape(kh * kw * C, N * Ho * Wo)
    return patches, N, Ho, Wo


def conv_bn_act_cm(x_cnhw, p, *, stride, pad, act, upsample_before=False):
    """One fused layer on (C, N, H, W) activations.

    [optional folded 2x nearest upsample] -> Conv2d (bias dropped: exactly
    cancelled by training-mode BN) -> BatchNorm2d (batch stats) -> activation.
    """
    Cout, _, kh, kw = p["w"].shape
    if upsample_before:
        patches, N, Ho, Wo = _im2col_upsample2_cm(x_cnhw, kh, kw)
    else:
        patches, N, Ho, Wo = _im2col_cm(x_cnhw, kh, kw, stride, pad)
    out_cm = _fused_layer(patches, p["w"], p["gamma"], p["beta"], act=act)
    return out_cm.reshape(Cout, N, Ho, Wo)


# ----------------------------------------------------------------------------
# Model: parameters + forward
# ----------------------------------------------------------------------------
def init_params(key, num_channels):
    nc = num_channels
    conv_specs = {
        # Encoder
        "e1": (nc, 3, 2, 2),
        "e2": (2 * nc, nc, 2, 2),
        "e3": (4 * nc, 2 * nc, 2, 2),
        "e4": (8 * nc, 4 * nc, 2, 2),
        # Decoder
        "d1": (8 * nc, 8 * nc, 2, 2),
        "d2": (4 * nc, 8 * nc, 2, 2),
        "d3": (2 * nc, 4 * nc, 2, 2),
        "d4": (nc, 2 * nc, 2, 2),
        "d5": (3, nc, 3, 3),
    }
    params = {}
    for name, (co, ci, kh, kw) in conv_specs.items():
        key, k1, k2 = jax.random.split(key, 3)
        scale = 1.0 / jnp.sqrt(jnp.float32(ci * kh * kw))
        params[name] = {
            # Bias kept in params (module has it; used by the reference), but
            # never fed to the kernel: training-mode BN cancels it exactly.
            "w": jax.random.uniform(k1, (co, ci, kh, kw), jnp.float32, -scale, scale),
            "b": jax.random.uniform(k2, (co,), jnp.float32, -scale, scale),
            "gamma": 1.0 + 0.05 * jnp.arange(co, dtype=jnp.float32) / co,
            "beta": 0.02 * jnp.arange(co, dtype=jnp.float32) / co,
        }
    return params


def dae_forward(x_nchw, params):
    # Module boundary: NCHW -> (C, N, H, W) once; inverse once at the end.
    x = jnp.transpose(x_nchw, (1, 0, 2, 3))
    # Encoder: 4x (conv k2 s2 -> bn -> relu)
    for name in ("e1", "e2", "e3", "e4"):
        x = conv_bn_act_cm(x, params[name], stride=2, pad=0, act="relu")
    # Decoder: conv(pad=1) then 4x (upsample folded into conv)
    x = conv_bn_act_cm(x, params["d1"], stride=1, pad=1, act="relu")
    for name in ("d2", "d3", "d4"):
        x = conv_bn_act_cm(x, params[name], stride=1, pad=0, act="relu",
                           upsample_before=True)
    x = conv_bn_act_cm(x, params["d5"], stride=1, pad=0, act="sigmoid",
                       upsample_before=True)
    return jnp.transpose(x, (1, 0, 2, 3))  # back to NCHW


# ----------------------------------------------------------------------------
# Pure-JAX reference (module semantics: bias + BN + materialized upsample)
# ----------------------------------------------------------------------------
def _upsample2_nchw(x):
    return jnp.repeat(jnp.repeat(x, 2, axis=2), 2, axis=3)


def _ref_layer(x, p, *, stride, pad, act):
    y = lax.conv_general_dilated(
        x, p["w"], (stride, stride), [(pad, pad), (pad, pad)],
        dimension_numbers=("NCHW", "OIHW", "NCHW"),
        precision=lax.Precision.HIGHEST)
    y = y + p["b"].reshape(1, -1, 1, 1)
    mean = jnp.mean(y, axis=(0, 2, 3), keepdims=True)
    var = jnp.mean((y - mean) ** 2, axis=(0, 2, 3), keepdims=True)
    y = (y - mean) * lax.rsqrt(var + EPS) * p["gamma"].reshape(1, -1, 1, 1) \
        + p["beta"].reshape(1, -1, 1, 1)
    return jnp.maximum(y, 0.0) if act == "relu" else jax.nn.sigmoid(y)


def dae_forward_ref(x, params):
    for name in ("e1", "e2", "e3", "e4"):
        x = _ref_layer(x, params[name], stride=2, pad=0, act="relu")
    x = _ref_layer(x, params["d1"], stride=1, pad=1, act="relu")
    for name in ("d2", "d3", "d4"):
        x = _upsample2_nchw(x)
        x = _ref_layer(x, params[name], stride=1, pad=0, act="relu")
    x = _upsample2_nchw(x)
    x = _ref_layer(x, params["d5"], stride=1, pad=0, act="sigmoid")
    return x


if __name__ == "__main__":
    num_channels = 4  # DenoisingAutoencoder(num_channels=4)
    key = jax.random.PRNGKey(0)
    kx, kp = jax.random.split(key)

    # Input: NCHW RGB image, spatial 16 (divisible by 2**4 for the encoder).
    x = jax.random.uniform(kx, (2, 3, 16, 16), dtype=jnp.float32)
    params = init_params(kp, num_channels)

    fwd = jax.jit(dae_forward)
    y = fwd(x, params)
    jax.block_until_ready(y)

    assert y.shape == (2, 3, 16, 16), y.shape
    assert y.dtype == jnp.float32

    y_ref = dae_forward_ref(x, params)
    assert jnp.all(jnp.isfinite(y))
    max_err = float(jnp.max(jnp.abs(y - y_ref)))
    assert jnp.allclose(y, y_ref, rtol=2e-3, atol=2e-3), max_err

    print("KERNEL_OK")
</pallas_src>

<mosaic_0001>
module attributes {stable_mosaic.version = 11 : i64} {
  func.func @_fused_conv_bn_act_kernel(%arg0: i32, %arg1: memref<4x12xf32, #tpu.memory_space<vmem>>, %arg2: memref<12x128xf32, #tpu.memory_space<vmem>>, %arg3: memref<4x2xf32, #tpu.memory_space<vmem>>, %arg4: memref<4x128xf32, #tpu.memory_space<vmem>>) attributes {dimension_semantics = [#tpu.dimension_semantics<arbitrary>], iteration_bounds = array<i64: 1>, scalar_prefetch = 0 : i64, scratch_operands = 0 : i64, tpu.core_type = #tpu.core_type<tc>, window_params = [{pipeline_mode = #tpu.pipeline_mode<synchronous>, transform_indices = @transform_0, window_bounds = array<i64: 4, 12>}, {pipeline_mode = #tpu.pipeline_mode<synchronous>, transform_indices = @transform_1, window_bounds = array<i64: 12, 128>}, {pipeline_mode = #tpu.pipeline_mode<synchronous>, transform_indices = @transform_2, window_bounds = array<i64: 4, 2>}, {pipeline_mode = #tpu.pipeline_mode<synchronous>, transform_indices = @transform_3, window_bounds = array<i64: 4, 128>}]} {
    %c0 = arith.constant 0 : index
    %c0_0 = arith.constant 0 : index
    %0 = vector.load %arg1[%c0, %c0_0] : memref<4x12xf32, #tpu.memory_space<vmem>>, vector<4x12xf32>
    %c0_1 = arith.constant 0 : index
    %c0_2 = arith.constant 0 : index
    %1 = vector.load %arg2[%c0_1, %c0_2] : memref<12x128xf32, #tpu.memory_space<vmem>>, vector<12x128xf32>
    %cst = arith.constant dense<0.000000e+00> : vector<4x128xf32>
    %2 = tpu.matmul %0, %1, %cst {dimension_numbers = #tpu.dot_dimension_numbers<[1], [0], [0], [1], [0, 0, 1, 1], [], []>} : vector<4x12xf32>, vector<12x128xf32>, vector<4x128xf32> -> vector<4x128xf32>
    %cst_3 = arith.constant dense<0.000000e+00> : vector<4xf32>
    %3 = vector.multi_reduction <add>, %2, %cst_3 [1] : vector<4x128xf32> to vector<4xf32>
    %4 = vector.shape_cast %3 : vector<4xf32> to vector<4x1xf32>
    %cst_4 = arith.constant 7.812500e-03 : f32
    %5 = vector.broadcast %cst_4 : f32 to vector<4x1xf32>
    %6 = arith.mulf %4, %5 : vector<4x1xf32>
    %7 = vector.broadcast %6 : vector<4x1xf32> to vector<4x128xf32>
    %8 = arith.subf %2, %7 : vector<4x128xf32>
    %9 = arith.mulf %8, %8 : vector<4x128xf32>
    %cst_5 = arith.constant dense<0.000000e+00> : vector<4xf32>
    %10 = vector.multi_reduction <add>, %9, %cst_5 [1] : vector<4x128xf32> to vector<4xf32>
    %11 = vector.shape_cast %10 : vector<4xf32> to vector<4x1xf32>
    %cst_6 = arith.constant 7.812500e-03 : f32
    %12 = vector.broadcast %cst_6 : f32 to vector<4x1xf32>
    %13 = arith.mulf %11, %12 : vector<4x1xf32>
    %c0_7 = arith.constant 0 : index
    %c0_8 = arith.constant 0 : index
    %14 = vector.load %arg3[%c0_7, %c0_8] : memref<4x2xf32, #tpu.memory_space<vmem>>, vector<4x1xf32>
    %c0_9 = arith.constant 0 : index
    %c1 = arith.constant 1 : index
    %15 = vector.load %arg3[%c0_9, %c1] : memref<4x2xf32, #tpu.memory_space<vmem>>, vector<4x1xf32>
    %cst_10 = arith.constant 9.99999974E-6 : f32
    %16 = vector.broadcast %cst_10 : f32 to vector<4x1xf32>
    %17 = arith.addf %13, %16 : vector<4x1xf32>
    %18 = math.rsqrt %17 : vector<4x1xf32>
    %19 = arith.mulf %14, %18 : vector<4x1xf32>
    %20 = vector.broadcast %19 : vector<4x1xf32> to vector<4x128xf32>
    %21 = arith.mulf %8, %20 : vector<4x128xf32>
    %22 = vector.broadcast %15 : vector<4x1xf32> to vector<4x128xf32>
    %23 = arith.addf %21, %22 : vector<4x128xf32>
    %cst_11 = arith.constant 0.000000e+00 : f32
    %24 = vector.broadcast %cst_11 : f32 to vector<4x128xf32>
    %25 = arith.maximumf %23, %24 : vector<4x128xf32>
    %c0_12 = arith.constant 0 : index
    %c0_13 = arith.constant 0 : index
    %26 = vector.load %arg4[%c0_12, %c0_13] : memref<4x128xf32, #tpu.memory_space<vmem>>, vector<4x128xf32>
    tpu.vector_store %arg4[%c0_12, %c0_13], %25 {strides = array<i32>} : memref<4x128xf32, #tpu.memory_space<vmem>>, vector<4x128xf32>,
    return
  }
  func.func @transform_0(%arg0: i32) -> (i32, i32) {
    %c0_i32 = arith.constant 0 : i32
    %c0_i32_0 = arith.constant 0 : i32
    %c0_i32_1 = arith.constant 0 : i32
    return %c0_i32, %c0_i32_0 : i32, i32
  }
  func.func @transform_1(%arg0: i32) -> (i32, i32) {
    %c0_i32 = arith.constant 0 : i32
    %c0_i32_0 = arith.constant 0 : i32
    %c0_i32_1 = arith.constant 0 : i32
    return %c0_i32, %c0_i32_0 : i32, i32
  }
  func.func @transform_2(%arg0: i32) -> (i32, i32) {
    %c0_i32 = arith.constant 0 : i32
    %c0_i32_0 = arith.constant 0 : i32
    %c0_i32_1 = arith.constant 0 : i32
    return %c0_i32, %c0_i32_0 : i32, i32
  }
  func.func @transform_3(%arg0: i32) -> (i32, i32) {
    %c0_i32 = arith.constant 0 : i32
    %c0_i32_0 = arith.constant 0 : i32
    %c0_i32_1 = arith.constant 0 : i32
    return %c0_i32, %c0_i32_0 : i32, i32
  }
}

module attributes {stable_mosaic.version = 11 : i64} {
  func.func @_fused_conv_bn_act_kernel(%arg0: i32, %arg1: memref<8x16xf32, #tpu.memory_space<vmem>>, %arg2: memref<16x32xf32, #tpu.memory_space<vmem>>, %arg3: memref<8x2xf32, #tpu.memory_space<vmem>>, %arg4: memref<8x32xf32, #tpu.memory_space<vmem>>) attributes {dimension_semantics = [#tpu.dimension_semantics<arbitrary>], iteration_bounds = array<i64: 1>, scalar_prefetch = 0 : i64, scratch_operands = 0 : i64, tpu.core_type = #tpu.core_type<tc>, window_params = [{pipeline_mode = #tpu.pipeline_mode<synchronous>, transform_indices = @transform_0, window_bounds = array<i64: 8, 16>}, {pipeline_mode = #tpu.pipeline_mode<synchronous>, transform_indices = @transform_1, window_bounds = array<i64: 16, 32>}, {pipeline_mode = #tpu.pipeline_mode<synchronous>, transform_indices = @transform_2, window_bounds = array<i64: 8, 2>}, {pipeline_mode = #tpu.pipeline_mode<synchronous>, transform_indices = @transform_3, window_bounds = array<i64: 8, 32>}]} {
    %c0 = arith.constant 0 : index
    %c0_0 = arith.constant 0 : index
    %0 = vector.load %arg1[%c0, %c0_0] : memref<8x16xf32, #tpu.memory_space<vmem>>, vector<8x16xf32>
    %c0_1 = arith.constant 0 : index
    %c0_2 = arith.constant 0 : index
    %1 = vector.load %arg2[%c0_1, %c0_2] : memref<16x32xf32, #tpu.memory_space<vmem>>, vector<16x32xf32>
    %cst = arith.constant dense<0.000000e+00> : vector<8x32xf32>
    %2 = tpu.matmul %0, %1, %cst {dimension_numbers = #tpu.dot_dimension_numbers<[1], [0], [0], [1], [0, 0, 1, 1], [], []>} : vector<8x16xf32>, vector<16x32xf32>, vector<8x32xf32> -> vector<8x32xf32>
    %cst_3 = arith.constant dense<0.000000e+00> : vector<8xf32>
    %3 = vector.multi_reduction <add>, %2, %cst_3 [1] : vector<8x32xf32> to vector<8xf32>
    %4 = vector.shape_cast %3 : vector<8xf32> to vector<8x1xf32>
    %cst_4 = arith.constant 3.125000e-02 : f32
    %5 = vector.broadcast %cst_4 : f32 to vector<8x1xf32>
    %6 = arith.mulf %4, %5 : vector<8x1xf32>
    %7 = vector.broadcast %6 : vector<8x1xf32> to vector<8x32xf32>
    %8 = arith.subf %2, %7 : vector<8x32xf32>
    %9 = arith.mulf %8, %8 : vector<8x32xf32>
    %cst_5 = arith.constant dense<0.000000e+00> : vector<8xf32>
    %10 = vector.multi_reduction <add>, %9, %cst_5 [1] : vector<8x32xf32> to vector<8xf32>
    %11 = vector.shape_cast %10 : vector<8xf32> to vector<8x1xf32>
    %cst_6 = arith.constant 3.125000e-02 : f32
    %12 = vector.broadcast %cst_6 : f32 to vector<8x1xf32>
    %13 = arith.mulf %11, %12 : vector<8x1xf32>
    %c0_7 = arith.constant 0 : index
    %c0_8 = arith.constant 0 : index
    %14 = vector.load %arg3[%c0_7, %c0_8] : memref<8x2xf32, #tpu.memory_space<vmem>>, vector<8x1xf32>
    %c0_9 = arith.constant 0 : index
    %c1 = arith.constant 1 : index
    %15 = vector.load %arg3[%c0_9, %c1] : memref<8x2xf32, #tpu.memory_space<vmem>>, vector<8x1xf32>
    %cst_10 = arith.constant 9.99999974E-6 : f32
    %16 = vector.broadcast %cst_10 : f32 to vector<8x1xf32>
    %17 = arith.addf %13, %16 : vector<8x1xf32>
    %18 = math.rsqrt %17 : vector<8x1xf32>
    %19 = arith.mulf %14, %18 : vector<8x1xf32>
    %20 = vector.broadcast %19 : vector<8x1xf32> to vector<8x32xf32>
    %21 = arith.mulf %8, %20 : vector<8x32xf32>
    %22 = vector.broadcast %15 : vector<8x1xf32> to vector<8x32xf32>
    %23 = arith.addf %21, %22 : vector<8x32xf32>
    %cst_11 = arith.constant 0.000000e+00 : f32
    %24 = vector.broadcast %cst_11 : f32 to vector<8x32xf32>
    %25 = arith.maximumf %23, %24 : vector<8x32xf32>
    %c0_12 = arith.constant 0 : index
    %c0_13 = arith.constant 0 : index
    %26 = vector.load %arg4[%c0_12, %c0_13] : memref<8x32xf32, #tpu.memory_space<vmem>>, vector<8x32xf32>
    tpu.vector_store %arg4[%c0_12, %c0_13], %25 {strides = array<i32>} : memref<8x32xf32, #tpu.memory_space<vmem>>, vector<8x32xf32>,
    return
  }
  func.func @transform_0(%arg0: i32) -> (i32, i32) {
    %c0_i32 = arith.constant 0 : i32
    %c0_i32_0 = arith.constant 0 : i32
    %c0_i32_1 = arith.constant 0 : i32
    return %c0_i32, %c0_i32_0 : i32, i32
  }
  func.func @transform_1(%arg0: i32) -> (i32, i32) {
    %c0_i32 = arith.constant 0 : i32
    %c0_i32_0 = arith.constant 0 : i32
    %c0_i32_1 = arith.constant 0 : i32
    return %c0_i32, %c0_i32_0 : i32, i32
  }
  func.func @transform_2(%arg0: i32) -> (i32, i32) {
    %c0_i32 = arith.constant 0 : i32
    %c0_i32_0 = arith.constant 0 : i32
    %c0_i32_1 = arith.constant 0 : i32
    return %c0_i32, %c0_i32_0 : i32, i32
  }
  func.func @transform_3(%arg0: i32) -> (i32, i32) {
    %c0_i32 = arith.constant 0 : i32
    %c0_i32_0 = arith.constant 0 : i32
    %c0_i32_1 = arith.constant 0 : i32
    return %c0_i32, %c0_i32_0 : i32, i32
  }
}

module attributes {stable_mosaic.version = 11 : i64} {
  func.func @_fused_conv_bn_act_kernel(%arg0: i32, %arg1: memref<16x32xf32, #tpu.memory_space<vmem>>, %arg2: memref<32x8xf32, #tpu.memory_space<vmem>>, %arg3: memref<16x2xf32, #tpu.memory_space<vmem>>, %arg4: memref<16x8xf32, #tpu.memory_space<vmem>>) attributes {dimension_semantics = [#tpu.dimension_semantics<arbitrary>], iteration_bounds = array<i64: 1>, scalar_prefetch = 0 : i64, scratch_operands = 0 : i64, tpu.core_type = #tpu.core_type<tc>, window_params = [{pipeline_mode = #tpu.pipeline_mode<synchronous>, transform_indices = @transform_0, window_bounds = array<i64: 16, 32>}, {pipeline_mode = #tpu.pipeline_mode<synchronous>, transform_indices = @transform_1, window_bounds = array<i64: 32, 8>}, {pipeline_mode = #tpu.pipeline_mode<synchronous>, transform_indices = @transform_2, window_bounds = array<i64: 16, 2>}, {pipeline_mode = #tpu.pipeline_mode<synchronous>, transform_indices = @transform_3, window_bounds = array<i64: 16, 8>}]} {
    %c0 = arith.constant 0 : index
    %c0_0 = arith.constant 0 : index
    %0 = vector.load %arg1[%c0, %c0_0] : memref<16x32xf32, #tpu.memory_space<vmem>>, vector<16x32xf32>
    %c0_1 = arith.constant 0 : index
    %c0_2 = arith.constant 0 : index
    %1 = vector.load %arg2[%c0_1, %c0_2] : memref<32x8xf32, #tpu.memory_space<vmem>>, vector<32x8xf32>
    %cst = arith.constant dense<0.000000e+00> : vector<16x8xf32>
    %2 = tpu.matmul %0, %1, %cst {dimension_numbers = #tpu.dot_dimension_numbers<[1], [0], [0], [1], [0, 0, 1, 1], [], []>} : vector<16x32xf32>, vector<32x8xf32>, vector<16x8xf32> -> vector<16x8xf32>
    %cst_3 = arith.constant dense<0.000000e+00> : vector<16xf32>
    %3 = vector.multi_reduction <add>, %2, %cst_3 [1] : vector<16x8xf32> to vector<16xf32>
    %4 = vector.shape_cast %3 : vector<16xf32> to vector<16x1xf32>
    %cst_4 = arith.constant 1.250000e-01 : f32
    %5 = vector.broadcast %cst_4 : f32 to vector<16x1xf32>
    %6 = arith.mulf %4, %5 : vector<16x1xf32>
    %7 = vector.broadcast %6 : vector<16x1xf32> to vector<16x8xf32>
    %8 = arith.subf %2, %7 : vector<16x8xf32>
    %9 = arith.mulf %8, %8 : vector<16x8xf32>
    %cst_5 = arith.constant dense<0.000000e+00> : vector<16xf32>
    %10 = vector.multi_reduction <add>, %9, %cst_5 [1] : vector<16x8xf32> to vector<16xf32>
    %11 = vector.shape_cast %10 : vector<16xf32> to vector<16x1xf32>
    %cst_6 = arith.constant 1.250000e-01 : f32
    %12 = vector.broadcast %cst_6 : f32 to vector<16x1xf32>
    %13 = arith.mulf %11, %12 : vector<16x1xf32>
    %c0_7 = arith.constant 0 : index
    %c0_8 = arith.constant 0 : index
    %14 = vector.load %arg3[%c0_7, %c0_8] : memref<16x2xf32, #tpu.memory_space<vmem>>, vector<16x1xf32>
    %c0_9 = arith.constant 0 : index
    %c1 = arith.constant 1 : index
    %15 = vector.load %arg3[%c0_9, %c1] : memref<16x2xf32, #tpu.memory_space<vmem>>, vector<16x1xf32>
    %cst_10 = arith.constant 9.99999974E-6 : f32
    %16 = vector.broadcast %cst_10 : f32 to vector<16x1xf32>
    %17 = arith.addf %13, %16 : vector<16x1xf32>
    %18 = math.rsqrt %17 : vector<16x1xf32>
    %19 = arith.mulf %14, %18 : vector<16x1xf32>
    %20 = vector.broadcast %19 : vector<16x1xf32> to vector<16x8xf32>
    %21 = arith.mulf %8, %20 : vector<16x8xf32>
    %22 = vector.broadcast %15 : vector<16x1xf32> to vector<16x8xf32>
    %23 = arith.addf %21, %22 : vector<16x8xf32>
    %cst_11 = arith.constant 0.000000e+00 : f32
    %24 = vector.broadcast %cst_11 : f32 to vector<16x8xf32>
    %25 = arith.maximumf %23, %24 : vector<16x8xf32>
    %c0_12 = arith.constant 0 : index
    %c0_13 = arith.constant 0 : index
    %26 = vector.load %arg4[%c0_12, %c0_13] : memref<16x8xf32, #tpu.memory_space<vmem>>, vector<16x8xf32>
    tpu.vector_store %arg4[%c0_12, %c0_13], %25 {strides = array<i32>} : memref<16x8xf32, #tpu.memory_space<vmem>>, vector<16x8xf32>,
    return
  }
  func.func @transform_0(%arg0: i32) -> (i32, i32) {
    %c0_i32 = arith.constant 0 : i32
    %c0_i32_0 = arith.constant 0 : i32
    %c0_i32_1 = arith.constant 0 : i32
    return %c0_i32, %c0_i32_0 : i32, i32
  }
  func.func @transform_1(%arg0: i32) -> (i32, i32) {
    %c0_i32 = arith.constant 0 : i32
    %c0_i32_0 = arith.constant 0 : i32
    %c0_i32_1 = arith.constant 0 : i32
    return %c0_i32, %c0_i32_0 : i32, i32
  }
  func.func @transform_2(%arg0: i32) -> (i32, i32) {
    %c0_i32 = arith.constant 0 : i32
    %c0_i32_0 = arith.constant 0 : i32
    %c0_i32_1 = arith.constant 0 : i32
    return %c0_i32, %c0_i32_0 : i32, i32
  }
  func.func @transform_3(%arg0: i32) -> (i32, i32) {
    %c0_i32 = arith.constant 0 : i32
    %c0_i32_0 = arith.constant 0 : i32
    %c0_i32_1 = arith.constant 0 : i32
    return %c0_i32, %c0_i32_0 : i32, i32
  }
}

module attributes {stable_mosaic.version = 11 : i64} {
  func.func @_fused_conv_bn_act_kernel(%arg0: i32, %arg1: memref<32x64xf32, #tpu.memory_space<vmem>>, %arg2: memref<64x2xf32, #tpu.memory_space<vmem>>, %arg3: memref<32x2xf32, #tpu.memory_space<vmem>>, %arg4: memref<32x2xf32, #tpu.memory_space<vmem>>) attributes {dimension_semantics = [#tpu.dimension_semantics<arbitrary>], iteration_bounds = array<i64: 1>, scalar_prefetch = 0 : i64, scratch_operands = 0 : i64, tpu.core_type = #tpu.core_type<tc>, window_params = [{pipeline_mode = #tpu.pipeline_mode<synchronous>, transform_indices = @transform_0, window_bounds = array<i64: 32, 64>}, {pipeline_mode = #tpu.pipeline_mode<synchronous>, transform_indices = @transform_1, window_bounds = array<i64: 64, 2>}, {pipeline_mode = #tpu.pipeline_mode<synchronous>, transform_indices = @transform_2, window_bounds = array<i64: 32, 2>}, {pipeline_mode = #tpu.pipeline_mode<synchronous>, transform_indices = @transform_3, window_bounds = array<i64: 32, 2>}]} {
    %c0 = arith.constant 0 : index
    %c0_0 = arith.constant 0 : index
    %0 = vector.load %arg1[%c0, %c0_0] : memref<32x64xf32, #tpu.memory_space<vmem>>, vector<32x64xf32>
    %c0_1 = arith.constant 0 : index
    %c0_2 = arith.constant 0 : index
    %1 = vector.load %arg2[%c0_1, %c0_2] : memref<64x2xf32, #tpu.memory_space<vmem>>, vector<64x2xf32>
    %cst = arith.constant dense<0.000000e+00> : vector<32x2xf32>
    %2 = tpu.matmul %0, %1, %cst {dimension_numbers = #tpu.dot_dimension_numbers<[1], [0], [0], [1], [0, 0, 1, 1], [], []>} : vector<32x64xf32>, vector<64x2xf32>, vector<32x2xf32> -> vector<32x2xf32>
    %cst_3 = arith.constant dense<0.000000e+00> : vector<32xf32>
    %3 = vector.multi_reduction <add>, %2, %cst_3 [1] : vector<32x2xf32> to vector<32xf32>
    %4 = vector.shape_cast %3 : vector<32xf32> to vector<32x1xf32>
    %cst_4 = arith.constant 5.000000e-01 : f32
    %5 = vector.broadcast %cst_4 : f32 to vector<32x1xf32>
    %6 = arith.mulf %4, %5 : vector<32x1xf32>
    %7 = vector.broadcast %6 : vector<32x1xf32> to vector<32x2xf32>
    %8 = arith.subf %2, %7 : vector<32x2xf32>
    %9 = arith.mulf %8, %8 : vector<32x2xf32>
    %cst_5 = arith.constant dense<0.000000e+00> : vector<32xf32>
    %10 = vector.multi_reduction <add>, %9, %cst_5 [1] : vector<32x2xf32> to vector<32xf32>
    %11 = vector.shape_cast %10 : vector<32xf32> to vector<32x1xf32>
    %cst_6 = arith.constant 5.000000e-01 : f32
    %12 = vector.broadcast %cst_6 : f32 to vector<32x1xf32>
    %13 = arith.mulf %11, %12 : vector<32x1xf32>
    %c0_7 = arith.constant 0 : index
    %c0_8 = arith.constant 0 : index
    %14 = vector.load %arg3[%c0_7, %c0_8] : memref<32x2xf32, #tpu.memory_space<vmem>>, vector<32x1xf32>
    %c0_9 = arith.constant 0 : index
    %c1 = arith.constant 1 : index
    %15 = vector.load %arg3[%c0_9, %c1] : memref<32x2xf32, #tpu.memory_space<vmem>>, vector<32x1xf32>
    %cst_10 = arith.constant 9.99999974E-6 : f32
    %16 = vector.broadcast %cst_10 : f32 to vector<32x1xf32>
    %17 = arith.addf %13, %16 : vector<32x1xf32>
    %18 = math.rsqrt %17 : vector<32x1xf32>
    %19 = arith.mulf %14, %18 : vector<32x1xf32>
    %20 = vector.broadcast %19 : vector<32x1xf32> to vector<32x2xf32>
    %21 = arith.mulf %8, %20 : vector<32x2xf32>
    %22 = vector.broadcast %15 : vector<32x1xf32> to vector<32x2xf32>
    %23 = arith.addf %21, %22 : vector<32x2xf32>
    %cst_11 = arith.constant 0.000000e+00 : f32
    %24 = vector.broadcast %cst_11 : f32 to vector<32x2xf32>
    %25 = arith.maximumf %23, %24 : vector<32x2xf32>
    %c0_12 = arith.constant 0 : index
    %c0_13 = arith.constant 0 : index
    %26 = vector.load %arg4[%c0_12, %c0_13] : memref<32x2xf32, #tpu.memory_space<vmem>>, vector<32x2xf32>
    tpu.vector_store %arg4[%c0_12, %c0_13], %25 {strides = array<i32>} : memref<32x2xf32, #tpu.memory_space<vmem>>, vector<32x2xf32>,
    return
  }
  func.func @transform_0(%arg0: i32) -> (i32, i32) {
    %c0_i32 = arith.constant 0 : i32
    %c0_i32_0 = arith.constant 0 : i32
    %c0_i32_1 = arith.constant 0 : i32
    return %c0_i32, %c0_i32_0 : i32, i32
  }
  func.func @transform_1(%arg0: i32) -> (i32, i32) {
    %c0_i32 = arith.constant 0 : i32
    %c0_i32_0 = arith.constant 0 : i32
    %c0_i32_1 = arith.constant 0 : i32
    return %c0_i32, %c0_i32_0 : i32, i32
  }
  func.func @transform_2(%arg0: i32) -> (i32, i32) {
    %c0_i32 = arith.constant 0 : i32
    %c0_i32_0 = arith.constant 0 : i32
    %c0_i32_1 = arith.constant 0 : i32
    return %c0_i32, %c0_i32_0 : i32, i32
  }
  func.func @transform_3(%arg0: i32) -> (i32, i32) {
    %c0_i32 = arith.constant 0 : i32
    %c0_i32_0 = arith.constant 0 : i32
    %c0_i32_1 = arith.constant 0 : i32
    return %c0_i32, %c0_i32_0 : i32, i32
  }
}

module attributes {stable_mosaic.version = 11 : i64} {
  func.func @_fused_conv_bn_act_kernel(%arg0: i32, %arg1: memref<32x128xf32, #tpu.memory_space<vmem>>, %arg2: memref<128x8xf32, #tpu.memory_space<vmem>>, %arg3: memref<32x2xf32, #tpu.memory_space<vmem>>, %arg4: memref<32x8xf32, #tpu.memory_space<vmem>>) attributes {dimension_semantics = [#tpu.dimension_semantics<arbitrary>], iteration_bounds = array<i64: 1>, scalar_prefetch = 0 : i64, scratch_operands = 0 : i64, tpu.core_type = #tpu.core_type<tc>, window_params = [{pipeline_mode = #tpu.pipeline_mode<synchronous>, transform_indices = @transform_0, window_bounds = array<i64: 32, 128>}, {pipeline_mode = #tpu.pipeline_mode<synchronous>, transform_indices = @transform_1, window_bounds = array<i64: 128, 8>}, {pipeline_mode = #tpu.pipeline_mode<synchronous>, transform_indices = @transform_2, window_bounds = array<i64: 32, 2>}, {pipeline_mode = #tpu.pipeline_mode<synchronous>, transform_indices = @transform_3, window_bounds = array<i64: 32, 8>}]} {
    %c0 = arith.constant 0 : index
    %c0_0 = arith.constant 0 : index
    %0 = vector.load %arg1[%c0, %c0_0] : memref<32x128xf32, #tpu.memory_space<vmem>>, vector<32x128xf32>
    %c0_1 = arith.constant 0 : index
    %c0_2 = arith.constant 0 : index
    %1 = vector.load %arg2[%c0_1, %c0_2] : memref<128x8xf32, #tpu.memory_space<vmem>>, vector<128x8xf32>
    %cst = arith.constant dense<0.000000e+00> : vector<32x8xf32>
    %2 = tpu.matmul %0, %1, %cst {dimension_numbers = #tpu.dot_dimension_numbers<[1], [0], [0], [1], [0, 0, 1, 1], [], []>} : vector<32x128xf32>, vector<128x8xf32>, vector<32x8xf32> -> vector<32x8xf32>
    %cst_3 = arith.constant dense<0.000000e+00> : vector<32xf32>
    %3 = vector.multi_reduction <add>, %2, %cst_3 [1] : vector<32x8xf32> to vector<32xf32>
    %4 = vector.shape_cast %3 : vector<32xf32> to vector<32x1xf32>
    %cst_4 = arith.constant 1.250000e-01 : f32
    %5 = vector.broadcast %cst_4 : f32 to vector<32x1xf32>
    %6 = arith.mulf %4, %5 : vector<32x1xf32>
    %7 = vector.broadcast %6 : vector<32x1xf32> to vector<32x8xf32>
    %8 = arith.subf %2, %7 : vector<32x8xf32>
    %9 = arith.mulf %8, %8 : vector<32x8xf32>
    %cst_5 = arith.constant dense<0.000000e+00> : vector<32xf32>
    %10 = vector.multi_reduction <add>, %9, %cst_5 [1] : vector<32x8xf32> to vector<32xf32>
    %11 = vector.shape_cast %10 : vector<32xf32> to vector<32x1xf32>
    %cst_6 = arith.constant 1.250000e-01 : f32
    %12 = vector.broadcast %cst_6 : f32 to vector<32x1xf32>
    %13 = arith.mulf %11, %12 : vector<32x1xf32>
    %c0_7 = arith.constant 0 : index
    %c0_8 = arith.constant 0 : index
    %14 = vector.load %arg3[%c0_7, %c0_8] : memref<32x2xf32, #tpu.memory_space<vmem>>, vector<32x1xf32>
    %c0_9 = arith.constant 0 : index
    %c1 = arith.constant 1 : index
    %15 = vector.load %arg3[%c0_9, %c1] : memref<32x2xf32, #tpu.memory_space<vmem>>, vector<32x1xf32>
    %cst_10 = arith.constant 9.99999974E-6 : f32
    %16 = vector.broadcast %cst_10 : f32 to vector<32x1xf32>
    %17 = arith.addf %13, %16 : vector<32x1xf32>
    %18 = math.rsqrt %17 : vector<32x1xf32>
    %19 = arith.mulf %14, %18 : vector<32x1xf32>
    %20 = vector.broadcast %19 : vector<32x1xf32> to vector<32x8xf32>
    %21 = arith.mulf %8, %20 : vector<32x8xf32>
    %22 = vector.broadcast %15 : vector<32x1xf32> to vector<32x8xf32>
    %23 = arith.addf %21, %22 : vector<32x8xf32>
    %cst_11 = arith.constant 0.000000e+00 : f32
    %24 = vector.broadcast %cst_11 : f32 to vector<32x8xf32>
    %25 = arith.maximumf %23, %24 : vector<32x8xf32>
    %c0_12 = arith.constant 0 : index
    %c0_13 = arith.constant 0 : index
    %26 = vector.load %arg4[%c0_12, %c0_13] : memref<32x8xf32, #tpu.memory_space<vmem>>, vector<32x8xf32>
    tpu.vector_store %arg4[%c0_12, %c0_13], %25 {strides = array<i32>} : memref<32x8xf32, #tpu.memory_space<vmem>>, vector<32x8xf32>,
    return
  }
  func.func @transform_0(%arg0: i32) -> (i32, i32) {
    %c0_i32 = arith.constant 0 : i32
    %c0_i32_0 = arith.constant 0 : i32
    %c0_i32_1 = arith.constant 0 : i32
    return %c0_i32, %c0_i32_0 : i32, i32
  }
  func.func @transform_1(%arg0: i32) -> (i32, i32) {
    %c0_i32 = arith.constant 0 : i32
    %c0_i32_0 = arith.constant 0 : i32
    %c0_i32_1 = arith.constant 0 : i32
    return %c0_i32, %c0_i32_0 : i32, i32
  }
  func.func @transform_2(%arg0: i32) -> (i32, i32) {
    %c0_i32 = arith.constant 0 : i32
    %c0_i32_0 = arith.constant 0 : i32
    %c0_i32_1 = arith.constant 0 : i32
    return %c0_i32, %c0_i32_0 : i32, i32
  }
  func.func @transform_3(%arg0: i32) -> (i32, i32) {
    %c0_i32 = arith.constant 0 : i32
    %c0_i32_0 = arith.constant 0 : i32
    %c0_i32_1 = arith.constant 0 : i32
    return %c0_i32, %c0_i32_0 : i32, i32
  }
}

module attributes {stable_mosaic.version = 11 : i64} {
  func.func @_fused_conv_bn_act_kernel(%arg0: i32, %arg1: memref<16x128xf32, #tpu.memory_space<vmem>>, %arg2: memref<128x18xf32, #tpu.memory_space<vmem>>, %arg3: memref<16x2xf32, #tpu.memory_space<vmem>>, %arg4: memref<16x18xf32, #tpu.memory_space<vmem>>) attributes {dimension_semantics = [#tpu.dimension_semantics<arbitrary>], iteration_bounds = array<i64: 1>, scalar_prefetch = 0 : i64, scratch_operands = 0 : i64, tpu.core_type = #tpu.core_type<tc>, window_params = [{pipeline_mode = #tpu.pipeline_mode<synchronous>, transform_indices = @transform_0, window_bounds = array<i64: 16, 128>}, {pipeline_mode = #tpu.pipeline_mode<synchronous>, transform_indices = @transform_1, window_bounds = array<i64: 128, 18>}, {pipeline_mode = #tpu.pipeline_mode<synchronous>, transform_indices = @transform_2, window_bounds = array<i64: 16, 2>}, {pipeline_mode = #tpu.pipeline_mode<synchronous>, transform_indices = @transform_3, window_bounds = array<i64: 16, 18>}]} {
    %c0 = arith.constant 0 : index
    %c0_0 = arith.constant 0 : index
    %0 = vector.load %arg1[%c0, %c0_0] : memref<16x128xf32, #tpu.memory_space<vmem>>, vector<16x128xf32>
    %c0_1 = arith.constant 0 : index
    %c0_2 = arith.constant 0 : index
    %1 = vector.load %arg2[%c0_1, %c0_2] : memref<128x18xf32, #tpu.memory_space<vmem>>, vector<128x18xf32>
    %cst = arith.constant dense<0.000000e+00> : vector<16x18xf32>
    %2 = tpu.matmul %0, %1, %cst {dimension_numbers = #tpu.dot_dimension_numbers<[1], [0], [0], [1], [0, 0, 1, 1], [], []>} : vector<16x128xf32>, vector<128x18xf32>, vector<16x18xf32> -> vector<16x18xf32>
    %cst_3 = arith.constant dense<0.000000e+00> : vector<16xf32>
    %3 = vector.multi_reduction <add>, %2, %cst_3 [1] : vector<16x18xf32> to vector<16xf32>
    %4 = vector.shape_cast %3 : vector<16xf32> to vector<16x1xf32>
    %cst_4 = arith.constant 0.055555556 : f32
    %5 = vector.broadcast %cst_4 : f32 to vector<16x1xf32>
    %6 = arith.mulf %4, %5 : vector<16x1xf32>
    %7 = vector.broadcast %6 : vector<16x1xf32> to vector<16x18xf32>
    %8 = arith.subf %2, %7 : vector<16x18xf32>
    %9 = arith.mulf %8, %8 : vector<16x18xf32>
    %cst_5 = arith.constant dense<0.000000e+00> : vector<16xf32>
    %10 = vector.multi_reduction <add>, %9, %cst_5 [1] : vector<16x18xf32> to vector<16xf32>
    %11 = vector.shape_cast %10 : vector<16xf32> to vector<16x1xf32>
    %cst_6 = arith.constant 0.055555556 : f32
    %12 = vector.broadcast %cst_6 : f32 to vector<16x1xf32>
    %13 = arith.mulf %11, %12 : vector<16x1xf32>
    %c0_7 = arith.constant 0 : index
    %c0_8 = arith.constant 0 : index
    %14 = vector.load %arg3[%c0_7, %c0_8] : memref<16x2xf32, #tpu.memory_space<vmem>>, vector<16x1xf32>
    %c0_9 = arith.constant 0 : index
    %c1 = arith.constant 1 : index
    %15 = vector.load %arg3[%c0_9, %c1] : memref<16x2xf32, #tpu.memory_space<vmem>>, vector<16x1xf32>
    %cst_10 = arith.constant 9.99999974E-6 : f32
    %16 = vector.broadcast %cst_10 : f32 to vector<16x1xf32>
    %17 = arith.addf %13, %16 : vector<16x1xf32>
    %18 = math.rsqrt %17 : vector<16x1xf32>
    %19 = arith.mulf %14, %18 : vector<16x1xf32>
    %20 = vector.broadcast %19 : vector<16x1xf32> to vector<16x18xf32>
    %21 = arith.mulf %8, %20 : vector<16x18xf32>
    %22 = vector.broadcast %15 : vector<16x1xf32> to vector<16x18xf32>
    %23 = arith.addf %21, %22 : vector<16x18xf32>
    %cst_11 = arith.constant 0.000000e+00 : f32
    %24 = vector.broadcast %cst_11 : f32 to vector<16x18xf32>
    %25 = arith.maximumf %23, %24 : vector<16x18xf32>
    %c0_12 = arith.constant 0 : index
    %c0_13 = arith.constant 0 : index
    %26 = vector.load %arg4[%c0_12, %c0_13] : memref<16x18xf32, #tpu.memory_space<vmem>>, vector<16x18xf32>
    tpu.vector_store %arg4[%c0_12, %c0_13], %25 {strides = array<i32>} : memref<16x18xf32, #tpu.memory_space<vmem>>, vector<16x18xf32>,
    return
  }
  func.func @transform_0(%arg0: i32) -> (i32, i32) {
    %c0_i32 = arith.constant 0 : i32
    %c0_i32_0 = arith.constant 0 : i32
    %c0_i32_1 = arith.constant 0 : i32
    return %c0_i32, %c0_i32_0 : i32, i32
  }
  func.func @transform_1(%arg0: i32) -> (i32, i32) {
    %c0_i32 = arith.constant 0 : i32
    %c0_i32_0 = arith.constant 0 : i32
    %c0_i32_1 = arith.constant 0 : i32
    return %c0_i32, %c0_i32_0 : i32, i32
  }
  func.func @transform_2(%arg0: i32) -> (i32, i32) {
    %c0_i32 = arith.constant 0 : i32
    %c0_i32_0 = arith.constant 0 : i32
    %c0_i32_1 = arith.constant 0 : i32
    return %c0_i32, %c0_i32_0 : i32, i32
  }
  func.func @transform_3(%arg0: i32) -> (i32, i32) {
    %c0_i32 = arith.constant 0 : i32
    %c0_i32_0 = arith.constant 0 : i32
    %c0_i32_1 = arith.constant 0 : i32
    return %c0_i32, %c0_i32_0 : i32, i32
  }
}

module attributes {stable_mosaic.version = 11 : i64} {
  func.func @_fused_conv_bn_act_kernel(%arg0: i32, %arg1: memref<8x64xf32, #tpu.memory_space<vmem>>, %arg2: memref<64x50xf32, #tpu.memory_space<vmem>>, %arg3: memref<8x2xf32, #tpu.memory_space<vmem>>, %arg4: memref<8x50xf32, #tpu.memory_space<vmem>>) attributes {dimension_semantics = [#tpu.dimension_semantics<arbitrary>], iteration_bounds = array<i64: 1>, scalar_prefetch = 0 : i64, scratch_operands = 0 : i64, tpu.core_type = #tpu.core_type<tc>, window_params = [{pipeline_mode = #tpu.pipeline_mode<synchronous>, transform_indices = @transform_0, window_bounds = array<i64: 8, 64>}, {pipeline_mode = #tpu.pipeline_mode<synchronous>, transform_indices = @transform_1, window_bounds = array<i64: 64, 50>}, {pipeline_mode = #tpu.pipeline_mode<synchronous>, transform_indices = @transform_2, window_bounds = array<i64: 8, 2>}, {pipeline_mode = #tpu.pipeline_mode<synchronous>, transform_indices = @transform_3, window_bounds = array<i64: 8, 50>}]} {
    %c0 = arith.constant 0 : index
    %c0_0 = arith.constant 0 : index
    %0 = vector.load %arg1[%c0, %c0_0] : memref<8x64xf32, #tpu.memory_space<vmem>>, vector<8x64xf32>
    %c0_1 = arith.constant 0 : index
    %c0_2 = arith.constant 0 : index
    %1 = vector.load %arg2[%c0_1, %c0_2] : memref<64x50xf32, #tpu.memory_space<vmem>>, vector<64x50xf32>
    %cst = arith.constant dense<0.000000e+00> : vector<8x50xf32>
    %2 = tpu.matmul %0, %1, %cst {dimension_numbers = #tpu.dot_dimension_numbers<[1], [0], [0], [1], [0, 0, 1, 1], [], []>} : vector<8x64xf32>, vector<64x50xf32>, vector<8x50xf32> -> vector<8x50xf32>
    %cst_3 = arith.constant dense<0.000000e+00> : vector<8xf32>
    %3 = vector.multi_reduction <add>, %2, %cst_3 [1] : vector<8x50xf32> to vector<8xf32>
    %4 = vector.shape_cast %3 : vector<8xf32> to vector<8x1xf32>
    %cst_4 = arith.constant 2.000000e-02 : f32
    %5 = vector.broadcast %cst_4 : f32 to vector<8x1xf32>
    %6 = arith.mulf %4, %5 : vector<8x1xf32>
    %7 = vector.broadcast %6 : vector<8x1xf32> to vector<8x50xf32>
    %8 = arith.subf %2, %7 : vector<8x50xf32>
    %9 = arith.mulf %8, %8 : vector<8x50xf32>
    %cst_5 = arith.constant dense<0.000000e+00> : vector<8xf32>
    %10 = vector.multi_reduction <add>, %9, %cst_5 [1] : vector<8x50xf32> to vector<8xf32>
    %11 = vector.shape_cast %10 : vector<8xf32> to vector<8x1xf32>
    %cst_6 = arith.constant 2.000000e-02 : f32
    %12 = vector.broadcast %cst_6 : f32 to vector<8x1xf32>
    %13 = arith.mulf %11, %12 : vector<8x1xf32>
    %c0_7 = arith.constant 0 : index
    %c0_8 = arith.constant 0 : index
    %14 = vector.load %arg3[%c0_7, %c0_8] : memref<8x2xf32, #tpu.memory_space<vmem>>, vector<8x1xf32>
    %c0_9 = arith.constant 0 : index
    %c1 = arith.constant 1 : index
    %15 = vector.load %arg3[%c0_9, %c1] : memref<8x2xf32, #tpu.memory_space<vmem>>, vector<8x1xf32>
    %cst_10 = arith.constant 9.99999974E-6 : f32
    %16 = vector.broadcast %cst_10 : f32 to vector<8x1xf32>
    %17 = arith.addf %13, %16 : vector<8x1xf32>
    %18 = math.rsqrt %17 : vector<8x1xf32>
    %19 = arith.mulf %14, %18 : vector<8x1xf32>
    %20 = vector.broadcast %19 : vector<8x1xf32> to vector<8x50xf32>
    %21 = arith.mulf %8, %20 : vector<8x50xf32>
    %22 = vector.broadcast %15 : vector<8x1xf32> to vector<8x50xf32>
    %23 = arith.addf %21, %22 : vector<8x50xf32>
    %cst_11 = arith.constant 0.000000e+00 : f32
    %24 = vector.broadcast %cst_11 : f32 to vector<8x50xf32>
    %25 = arith.maximumf %23, %24 : vector<8x50xf32>
    %c0_12 = arith.constant 0 : index
    %c0_13 = arith.constant 0 : index
    %26 = vector.load %arg4[%c0_12, %c0_13] : memref<8x50xf32, #tpu.memory_space<vmem>>, vector<8x50xf32>
    tpu.vector_store %arg4[%c0_12, %c0_13], %25 {strides = array<i32>} : memref<8x50xf32, #tpu.memory_space<vmem>>, vector<8x50xf32>,
    return
  }
  func.func @transform_0(%arg0: i32) -> (i32, i32) {
    %c0_i32 = arith.constant 0 : i32
    %c0_i32_0 = arith.constant 0 : i32
    %c0_i32_1 = arith.constant 0 : i32
    return %c0_i32, %c0_i32_0 : i32, i32
  }
  func.func @transform_1(%arg0: i32) -> (i32, i32) {
    %c0_i32 = arith.constant 0 : i32
    %c0_i32_0 = arith.constant 0 : i32
    %c0_i32_1 = arith.constant 0 : i32
    return %c0_i32, %c0_i32_0 : i32, i32
  }
  func.func @transform_2(%arg0: i32) -> (i32, i32) {
    %c0_i32 = arith.constant 0 : i32
    %c0_i32_0 = arith.constant 0 : i32
    %c0_i32_1 = arith.constant 0 : i32
    return %c0_i32, %c0_i32_0 : i32, i32
  }
  func.func @transform_3(%arg0: i32) -> (i32, i32) {
    %c0_i32 = arith.constant 0 : i32
    %c0_i32_0 = arith.constant 0 : i32
    %c0_i32_1 = arith.constant 0 : i32
    return %c0_i32, %c0_i32_0 : i32, i32
  }
}

module attributes {stable_mosaic.version = 11 : i64} {
  func.func @_fused_conv_bn_act_kernel(%arg0: i32, %arg1: memref<4x32xf32, #tpu.memory_space<vmem>>, %arg2: memref<32x162xf32, #tpu.memory_space<vmem>>, %arg3: memref<4x2xf32, #tpu.memory_space<vmem>>, %arg4: memref<4x162xf32, #tpu.memory_space<vmem>>) attributes {dimension_semantics = [#tpu.dimension_semantics<arbitrary>], iteration_bounds = array<i64: 1>, scalar_prefetch = 0 : i64, scratch_operands = 0 : i64, tpu.core_type = #tpu.core_type<tc>, window_params = [{pipeline_mode = #tpu.pipeline_mode<synchronous>, transform_indices = @transform_0, window_bounds = array<i64: 4, 32>}, {pipeline_mode = #tpu.pipeline_mode<synchronous>, transform_indices = @transform_1, window_bounds = array<i64: 32, 162>}, {pipeline_mode = #tpu.pipeline_mode<synchronous>, transform_indices = @transform_2, window_bounds = array<i64: 4, 2>}, {pipeline_mode = #tpu.pipeline_mode<synchronous>, transform_indices = @transform_3, window_bounds = array<i64: 4, 162>}]} {
    %c0 = arith.constant 0 : index
    %c0_0 = arith.constant 0 : index
    %0 = vector.load %arg1[%c0, %c0_0] : memref<4x32xf32, #tpu.memory_space<vmem>>, vector<4x32xf32>
    %c0_1 = arith.constant 0 : index
    %c0_2 = arith.constant 0 : index
    %1 = vector.load %arg2[%c0_1, %c0_2] : memref<32x162xf32, #tpu.memory_space<vmem>>, vector<32x162xf32>
    %cst = arith.constant dense<0.000000e+00> : vector<4x162xf32>
    %2 = tpu.matmul %0, %1, %cst {dimension_numbers = #tpu.dot_dimension_numbers<[1], [0], [0], [1], [0, 0, 1, 1], [], []>} : vector<4x32xf32>, vector<32x162xf32>, vector<4x162xf32> -> vector<4x162xf32>
    %cst_3 = arith.constant dense<0.000000e+00> : vector<4xf32>
    %3 = vector.multi_reduction <add>, %2, %cst_3 [1] : vector<4x162xf32> to vector<4xf32>
    %4 = vector.shape_cast %3 : vector<4xf32> to vector<4x1xf32>
    %cst_4 = arith.constant 0.00617283955 : f32
    %5 = vector.broadcast %cst_4 : f32 to vector<4x1xf32>
    %6 = arith.mulf %4, %5 : vector<4x1xf32>
    %7 = vector.broadcast %6 : vector<4x1xf32> to vector<4x162xf32>
    %8 = arith.subf %2, %7 : vector<4x162xf32>
    %9 = arith.mulf %8, %8 : vector<4x162xf32>
    %cst_5 = arith.constant dense<0.000000e+00> : vector<4xf32>
    %10 = vector.multi_reduction <add>, %9, %cst_5 [1] : vector<4x162xf32> to vector<4xf32>
    %11 = vector.shape_cast %10 : vector<4xf32> to vector<4x1xf32>
    %cst_6 = arith.constant 0.00617283955 : f32
    %12 = vector.broadcast %cst_6 : f32 to vector<4x1xf32>
    %13 = arith.mulf %11, %12 : vector<4x1xf32>
    %c0_7 = arith.constant 0 : index
    %c0_8 = arith.constant 0 : index
    %14 = vector.load %arg3[%c0_7, %c0_8] : memref<4x2xf32, #tpu.memory_space<vmem>>, vector<4x1xf32>
    %c0_9 = arith.constant 0 : index
    %c1 = arith.constant 1 : index
    %15 = vector.load %arg3[%c0_9, %c1] : memref<4x2xf32, #tpu.memory_space<vmem>>, vector<4x1xf32>
    %cst_10 = arith.constant 9.99999974E-6 : f32
    %16 = vector.broadcast %cst_10 : f32 to vector<4x1xf32>
    %17 = arith.addf %13, %16 : vector<4x1xf32>
    %18 = math.rsqrt %17 : vector<4x1xf32>
    %19 = arith.mulf %14, %18 : vector<4x1xf32>
    %20 = vector.broadcast %19 : vector<4x1xf32> to vector<4x162xf32>
    %21 = arith.mulf %8, %20 : vector<4x162xf32>
    %22 = vector.broadcast %15 : vector<4x1xf32> to vector<4x162xf32>
    %23 = arith.addf %21, %22 : vector<4x162xf32>
    %cst_11 = arith.constant 0.000000e+00 : f32
    %24 = vector.broadcast %cst_11 : f32 to vector<4x162xf32>
    %25 = arith.maximumf %23, %24 : vector<4x162xf32>
    %c0_12 = arith.constant 0 : index
    %c0_13 = arith.constant 0 : index
    %26 = vector.load %arg4[%c0_12, %c0_13] : memref<4x162xf32, #tpu.memory_space<vmem>>, vector<4x162xf32>
    tpu.vector_store %arg4[%c0_12, %c0_13], %25 {strides = array<i32>} : memref<4x162xf32, #tpu.memory_space<vmem>>, vector<4x162xf32>,
    return
  }
  func.func @transform_0(%arg0: i32) -> (i32, i32) {
    %c0_i32 = arith.constant 0 : i32
    %c0_i32_0 = arith.constant 0 : i32
    %c0_i32_1 = arith.constant 0 : i32
    return %c0_i32, %c0_i32_0 : i32, i32
  }
  func.func @transform_1(%arg0: i32) -> (i32, i32) {
    %c0_i32 = arith.constant 0 : i32
    %c0_i32_0 = arith.constant 0 : i32
    %c0_i32_1 = arith.constant 0 : i32
    return %c0_i32, %c0_i32_0 : i32, i32
  }
  func.func @transform_2(%arg0: i32) -> (i32, i32) {
    %c0_i32 = arith.constant 0 : i32
    %c0_i32_0 = arith.constant 0 : i32
    %c0_i32_1 = arith.constant 0 : i32
    return %c0_i32, %c0_i32_0 : i32, i32
  }
  func.func @transform_3(%arg0: i32) -> (i32, i32) {
    %c0_i32 = arith.constant 0 : i32
    %c0_i32_0 = arith.constant 0 : i32
    %c0_i32_1 = arith.constant 0 : i32
    return %c0_i32, %c0_i32_0 : i32, i32
  }
}

module attributes {stable_mosaic.version = 11 : i64} {
  func.func @_fused_conv_bn_act_kernel(%arg0: i32, %arg1: memref<3x36xf32, #tpu.memory_space<vmem>>, %arg2: memref<36x512xf32, #tpu.memory_space<vmem>>, %arg3: memref<3x2xf32, #tpu.memory_space<vmem>>, %arg4: memref<3x512xf32, #tpu.memory_space<vmem>>) attributes {dimension_semantics = [#tpu.dimension_semantics<arbitrary>], iteration_bounds = array<i64: 1>, scalar_prefetch = 0 : i64, scratch_operands = 0 : i64, tpu.core_type = #tpu.core_type<tc>, window_params = [{pipeline_mode = #tpu.pipeline_mode<synchronous>, transform_indices = @transform_0, window_bounds = array<i64: 3, 36>}, {pipeline_mode = #tpu.pipeline_mode<synchronous>, transform_indices = @transform_1, window_bounds = array<i64: 36, 512>}, {pipeline_mode = #tpu.pipeline_mode<synchronous>, transform_indices = @transform_2, window_bounds = array<i64: 3, 2>}, {pipeline_mode = #tpu.pipeline_mode<synchronous>, transform_indices = @transform_3, window_bounds = array<i64: 3, 512>}]} {
    %c0 = arith.constant 0 : index
    %c0_0 = arith.constant 0 : index
    %0 = vector.load %arg1[%c0, %c0_0] : memref<3x36xf32, #tpu.memory_space<vmem>>, vector<3x36xf32>
    %c0_1 = arith.constant 0 : index
    %c0_2 = arith.constant 0 : index
    %1 = vector.load %arg2[%c0_1, %c0_2] : memref<36x512xf32, #tpu.memory_space<vmem>>, vector<36x512xf32>
    %cst = arith.constant dense<0.000000e+00> : vector<3x512xf32>
    %2 = tpu.matmul %0, %1, %cst {dimension_numbers = #tpu.dot_dimension_numbers<[1], [0], [0], [1], [0, 0, 1, 1], [], []>} : vector<3x36xf32>, vector<36x512xf32>, vector<3x512xf32> -> vector<3x512xf32>
    %cst_3 = arith.constant dense<0.000000e+00> : vector<3xf32>
    %3 = vector.multi_reduction <add>, %2, %cst_3 [1] : vector<3x512xf32> to vector<3xf32>
    %4 = vector.shape_cast %3 : vector<3xf32> to vector<3x1xf32>
    %cst_4 = arith.constant 0.001953125 : f32
    %5 = vector.broadcast %cst_4 : f32 to vector<3x1xf32>
    %6 = arith.mulf %4, %5 : vector<3x1xf32>
    %7 = vector.broadcast %6 : vector<3x1xf32> to vector<3x512xf32>
    %8 = arith.subf %2, %7 : vector<3x512xf32>
    %9 = arith.mulf %8, %8 : vector<3x512xf32>
    %cst_5 = arith.constant dense<0.000000e+00> : vector<3xf32>
    %10 = vector.multi_reduction <add>, %9, %cst_5 [1] : vector<3x512xf32> to vector<3xf32>
    %11 = vector.shape_cast %10 : vector<3xf32> to vector<3x1xf32>
    %cst_6 = arith.constant 0.001953125 : f32
    %12 = vector.broadcast %cst_6 : f32 to vector<3x1xf32>
    %13 = arith.mulf %11, %12 : vector<3x1xf32>
    %c0_7 = arith.constant 0 : index
    %c0_8 = arith.constant 0 : index
    %14 = vector.load %arg3[%c0_7, %c0_8] : memref<3x2xf32, #tpu.memory_space<vmem>>, vector<3x1xf32>
    %c0_9 = arith.constant 0 : index
    %c1 = arith.constant 1 : index
    %15 = vector.load %arg3[%c0_9, %c1] : memref<3x2xf32, #tpu.memory_space<vmem>>, vector<3x1xf32>
    %cst_10 = arith.constant 9.99999974E-6 : f32
    %16 = vector.broadcast %cst_10 : f32 to vector<3x1xf32>
    %17 = arith.addf %13, %16 : vector<3x1xf32>
    %18 = math.rsqrt %17 : vector<3x1xf32>
    %19 = arith.mulf %14, %18 : vector<3x1xf32>
    %20 = vector.broadcast %19 : vector<3x1xf32> to vector<3x512xf32>
    %21 = arith.mulf %8, %20 : vector<3x512xf32>
    %22 = vector.broadcast %15 : vector<3x1xf32> to vector<3x512xf32>
    %23 = arith.addf %21, %22 : vector<3x512xf32>
    %cst_11 = arith.constant 0.000000e+00 : f32
    %24 = vector.broadcast %cst_11 : f32 to vector<3x512xf32>
    %25 = arith.subf %24, %23 : vector<3x512xf32>
    %26 = math.exp %25 : vector<3x512xf32>
    %cst_12 = arith.constant 1.000000e+00 : f32
    %27 = vector.broadcast %cst_12 : f32 to vector<3x512xf32>
    %28 = arith.addf %27, %26 : vector<3x512xf32>
    %29 = tpu.reciprocal %28 {approx = true} : vector<3x512xf32> -> vector<3x512xf32>
    %c0_13 = arith.constant 0 : index
    %c0_14 = arith.constant 0 : index
    %30 = vector.load %arg4[%c0_13, %c0_14] : memref<3x512xf32, #tpu.memory_space<vmem>>, vector<3x512xf32>
    tpu.vector_store %arg4[%c0_13, %c0_14], %29 {strides = array<i32>} : memref<3x512xf32, #tpu.memory_space<vmem>>, vector<3x512xf32>,
    return
  }
  func.func @transform_0(%arg0: i32) -> (i32, i32) {
    %c0_i32 = arith.constant 0 : i32
    %c0_i32_0 = arith.constant 0 : i32
    %c0_i32_1 = arith.constant 0 : i32
    return %c0_i32, %c0_i32_0 : i32, i32
  }
  func.func @transform_1(%arg0: i32) -> (i32, i32) {
    %c0_i32 = arith.constant 0 : i32
    %c0_i32_0 = arith.constant 0 : i32
    %c0_i32_1 = arith.constant 0 : i32
    return %c0_i32, %c0_i32_0 : i32, i32
  }
  func.func @transform_2(%arg0: i32) -> (i32, i32) {
    %c0_i32 = arith.constant 0 : i32
    %c0_i32_0 = arith.constant 0 : i32
    %c0_i32_1 = arith.constant 0 : i32
    return %c0_i32, %c0_i32_0 : i32, i32
  }
  func.func @transform_3(%arg0: i32) -> (i32, i32) {
    %c0_i32 = arith.constant 0 : i32
    %c0_i32_0 = arith.constant 0 : i32
    %c0_i32_1 = arith.constant 0 : i32
    return %c0_i32, %c0_i32_0 : i32, i32
  }
}

</mosaic_0001>

<bundles_post_ra>
// kernel: dae_forward.9
= control target key start
LH: loop header
LB: loop body
LE: loop exit
PB: predicated region body
PF: predicated region fallthrough
CT: control target
= control target key end

     0   :  { %vm21_vm0 = vcmask 1043456   ;;  %v154_v0 = vmov 0.0|0.0   ;;  %vm155_vm1 = vmmov 1   ;;  %vm156_vm3 = vmmov 0   ;;  %s198_s1 = inlined_call_operand.vmem [shape: f32[12,128], index: 1, kind: input, shape index: {}]   ;;  %s199_s0 = inlined_call_operand.vmem [shape: f32[4,12], index: 0, kind: input, shape index: {}]   ;;  %s200_s2 = inlined_call_operand.vmem [shape: f32[4,2], index: 2, kind: input, shape index: {}]   ;;  %s201_s3 = inlined_call_operand.vmem [shape: f32[4,128], index: 3, kind: output, shape index: {}]  }
   0x1   :  { %139 = vmatprep.subr.bf16.mxu0 %v154_v0  ;;  %v15_v1 = vld [vmem:[%s198_s1] sm:$0xff]  ;;  %v16_v2 = vld [vmem:[%s198_s1 + $0x8] sm:$0xf]  ;;  %vm141_vm2 = vmpackc.low %vm21_vm0, %vm155_vm1  ;;  %v157_v4 = vmov 0.0   ;;  %vm17_vm4 = vcmask 97280   ;;  %v158_v14 = vmov 0  }
   0x2   :  { %v140_v3 = vpack.c.bf16 %v16_v2, %v15_v1  ;;  %136 = vmatprep.mubr.msk.f32.mxu0 %vm156_vm3, %v157_v4  ;;  %v14_v5 = vld [vmem:[%s199_s0] sm:$0xf]  ;;  %149 = vset.pattern.permute.xlu1 %v158_v14  ;;  %v159_v15 = vmov 1  }
   0x3   :  { %151 = vset.pattern.permute.xlu0 %v159_v15  ;;  %v105_v19 = vld [vmem:[%s200_s2] sm:$0xf] }
   0x4   :  { %142 = vmatpush3.bf16.msk.msra.mxu0 %vm141_vm2, %v140_v3 }
   0x7   :  { %137 = vmatmul.mubr.msk.f32.vlgmr.msra.gmra.mrb[0].mxu0 %vm17_vm4, %v14_v5 }
  0xda   :  { %v91_v6 = vpop.f32.mrb[0].mxu0 }
  0xdb   :  { %v138_v7 = vpop.f32.mrb[1].mxu0  ;;  %v95_v8 = vsel %vm21_vm0, %v91_v6, 0.0 }
  0xdc   :  { %96 = vadd.xlane.f32.xlu0 %v95_v8 }
 0x169   :  { %v97_v9 = vpop.xlane.xlu0 %96 }
 0x16a   :  { %v98_v10 = vmul.f32 0.0078125, %v97_v9 }
 0x16c   :  { %v99_v11 = vsub.f32 %v91_v6, %v98_v10 }
 0x16e   :  { %v100_v12 = vmul.f32 %v99_v11, %v99_v11 }
 0x170   :  { %v101_v13 = vsel %vm21_vm0, %v100_v12, 0.0 }
 0x171   :  { %102 = vadd.xlane.f32.xlu0 %v101_v13 }
 0x1fe   :  { %v103_v16 = vpop.xlane.xlu0 %102 }
 0x1ff   :  { %v104_v17 = vmul.f32 0.0078125, %v103_v16 }
 0x201   :  { %v106_v18 = vadd.f32 1e-05, %v104_v17 }
 0x203   :  { %152 = vrsqrt.f32 %v106_v18 }
 0x20d   :  { %v153_v20 = vpop.eup %152 }
 0x20e   :  { %v108_v21 = vmul.f32 %v153_v20, %v105_v19 }
 0x210   :  { %111 = vperm.xlu1 %149, %v108_v21  }
 0x214   :  { %150 = vset.pattern.permute.xlu1 %v159_v15 }
 0x215   :  { %117 = vperm.xlu1 %150, %v105_v19  }
 0x28f   :  { %v112_v22 = vpop.permute.xlu1 %111 }
 0x290   :  { %v114_v23 = vmul.f32 %v112_v22, %v99_v11 }
 0x294   :  { %v118_v24 = vpop.permute.xlu1 %117 }
 0x295   :  { %v120_v25 = vadd.f32 %v118_v24, %v114_v23 }
 0x297   :  { %v121_v26 = vmax.f32 %v120_v25, 0.0 }
 0x299   :  { %122 = vst [vmem:[%s201_s3] sm:$0xf] %v121_v26 }

// kernel: dae_forward.10
= control target key start
LH: loop header
LB: loop body
LE: loop exit
PB: predicated region body
PF: predicated region fallthrough
CT: control target
= control target key end

     0   :  { %v148_v0 = vmov 0.0|0.0   ;;  %vm149_vm0 = vmmov 0   ;;  %v150_v3 = vmov 0.0   ;;  %vm17_vm1 = vcmask 130048   ;;  %s191_s1 = inlined_call_operand.vmem [shape: f32[16,32], index: 1, kind: input, shape index: {}]   ;;  %s192_s0 = inlined_call_operand.vmem [shape: f32[8,16], index: 0, kind: input, shape index: {}]   ;;  %s193_s2 = inlined_call_operand.vmem [shape: f32[8,2], index: 2, kind: input, shape index: {}]   ;;  %s194_s3 = inlined_call_operand.vmem [shape: f32[8,32], index: 3, kind: output, shape index: {}]  }
   0x1   :  { %135 = vmatprep.subr.bf16.mxu0 %v148_v0  ;;  %v15_v1 = vld [vmem:[%s191_s1] sm:$0xff]  ;;  %v16_v2 = vld [vmem:[%s191_s1 + $0x8] sm:$0xff]  ;;  %132 = vmatprep.mubr.msk.f32.mxu0 %vm149_vm0, %v150_v3  ;;  %vm91_vm2 = vcmask 261120   ;;  %v151_v14 = vmov 0   ;;  %v152_v15 = vmov 1  }
   0x2   :  { %v136_v4 = vpack.c.bf16 %v16_v2, %v15_v1  ;;  %v14_v5 = vld [vmem:[%s192_s0] sm:$0xff]  ;;  %143 = vset.pattern.permute.xlu1 %v151_v14  ;;  %145 = vset.pattern.permute.xlu0 %v152_v15 }
   0x3   :  { %v102_v19 = vld [vmem:[%s193_s2] sm:$0xff] }
   0x4   :  { %137 = vmatpush3.bf16.msra.mxu0 %v136_v4 }
   0x7   :  { %133 = vmatmul.mubr.msk.f32.vlgmr.msra.gmra.mrb[0].mxu0 %vm17_vm1, %v14_v5 }
  0xda   :  { %v87_v6 = vpop.f32.mrb[0].mxu0 }
  0xdb   :  { %v134_v7 = vpop.f32.mrb[1].mxu0  ;;  %v92_v8 = vsel %vm91_vm2, %v87_v6, 0.0 }
  0xdc   :  { %93 = vadd.xlane.f32.xlu0 %v92_v8 }
 0x169   :  { %v94_v9 = vpop.xlane.xlu0 %93 }
 0x16a   :  { %v95_v10 = vmul.f32 0.03125, %v94_v9 }
 0x16c   :  { %v96_v11 = vsub.f32 %v87_v6, %v95_v10 }
 0x16e   :  { %v97_v12 = vmul.f32 %v96_v11, %v96_v11 }
 0x170   :  { %v98_v13 = vsel %vm91_vm2, %v97_v12, 0.0 }
 0x171   :  { %99 = vadd.xlane.f32.xlu0 %v98_v13 }
 0x1fe   :  { %v100_v16 = vpop.xlane.xlu0 %99 }
 0x1ff   :  { %v101_v17 = vmul.f32 0.03125, %v100_v16 }
 0x201   :  { %v103_v18 = vadd.f32 1e-05, %v101_v17 }
 0x203   :  { %146 = vrsqrt.f32 %v103_v18 }
 0x20d   :  { %v147_v20 = vpop.eup %146 }
 0x20e   :  { %v105_v21 = vmul.f32 %v147_v20, %v102_v19 }
 0x210   :  { %108 = vperm.xlu1 %143, %v105_v21  }
 0x214   :  { %144 = vset.pattern.permute.xlu1 %v152_v15 }
 0x215   :  { %114 = vperm.xlu1 %144, %v102_v19  }
 0x28f   :  { %v109_v22 = vpop.permute.xlu1 %108 }
 0x290   :  { %v111_v23 = vmul.f32 %v109_v22, %v96_v11 }
 0x294   :  { %v115_v24 = vpop.permute.xlu1 %114 }
 0x295   :  { %v117_v25 = vadd.f32 %v115_v24, %v111_v23 }
 0x297   :  { %v118_v26 = vmax.f32 %v117_v25, 0.0 }
 0x299   :  { %119 = vst.msk [vmem:[%s194_s3] sm:$0xff] %vm91_vm2, %v118_v26 }

// kernel: dae_forward.11
= control target key start
LH: loop header
LB: loop body
LE: loop exit
PB: predicated region body
PF: predicated region fallthrough
CT: control target
= control target key end

     0   :  { %vm20_vm0 = vcmask 261120   ;;  %vm102_vm1 = vcmask 64512   ;;  %v200_v22 = vmov 0   ;;  %v201_v35 = vmov 1   ;;  %s258_s1 = inlined_call_operand.vmem [shape: f32[32,8], index: 1, kind: input, shape index: {}]   ;;  %s259_s0 = inlined_call_operand.vmem [shape: f32[16,32], index: 0, kind: input, shape index: {}]   ;;  %s260_s2 = inlined_call_operand.vmem [shape: f32[16,2], index: 2, kind: input, shape index: {}]   ;;  %s261_s3 = inlined_call_operand.vmem [shape: f32[16,8], index: 3, kind: output, shape index: {}]  }
   0x1   :  { %v16_v0 = vld [vmem:[%s258_s1] sm:$0xff]  ;;  %v17_v1 = vld [vmem:[%s258_s1 + $0x8] sm:$0xff]  ;;  %v18_v2 = vld [vmem:[%s258_s1 + $0x10] sm:$0xff]  ;;  %192 = vset.pattern.permute.xlu0 %v200_v22  ;;  %193 = vset.pattern.permute.xlu1 %v200_v22 }
   0x2   :  { %v182_v3 = vpack.c.bf16 %v17_v1, %v16_v0  ;;  %v19_v4 = vld [vmem:[%s258_s1 + $0x18] sm:$0xff]  ;;  %v14_v5 = vld [vmem:[%s259_s0] sm:$0xff]  ;;  %v15_v7 = vld [vmem:[%s259_s0 + $0x8] sm:$0xff] }
   0x3   :  { %v186_v6 = vpack.c.bf16 %v19_v4, %v18_v2  ;;  %179 = vmatprep.mubr.msk.f32.mxu0 %vm20_vm0, %v14_v5  ;;  %v123_v29 = vld [vmem:[%s260_s2] sm:$0xff]  ;;  %v124_v32 = vld [vmem:[%s260_s2 + $0x8] sm:$0xff] }
   0x4   :  { %183 = vmatprep.subr.bf16.mxu0 %v182_v3 }
   0x5   :  { %185 = vmatpush3.bf16.msra.mxu0 %v182_v3 }
   0x6   :  { %187 = vmatprep.subr.bf16.mxu0 %v186_v6 }
   0x9   :  { %189 = vmatpush3.bf16.msra.mxu0 %v186_v6 }
   0xc   :  { %180 = vmatmul.mubr.msk.f32.vlgmr.msra.gmra.mrb[0].mxu0 %vm20_vm0, %v15_v7 }
  0xdf   :  { %v181_v8 = vpop.f32.mrb[0].mxu0 }
  0xe0   :  { %v93_v9 = vpop.f32.mrb[1].mxu0  ;;  %v106_v11 = vsel %vm102_vm1, %v181_v8, 0.0 }
  0xe1   :  { %v103_v10 = vsel %vm102_vm1, %v93_v9, 0.0 }
  0xe2   :  { %104 = vadd.xlane.f32.xlu0 %v103_v10 }
  0xe6   :  { %107 = vadd.xlane.f32.xlu0 %v106_v11 }
 0x16f   :  { %v105_v12 = vpop.xlane.xlu0 %104 }
 0x170   :  { %v109_v13 = vmul.f32 0.125, %v105_v12 }
 0x172   :  { %v111_v14 = vsub.f32 %v93_v9, %v109_v13 }
 0x173   :  { %v108_v15 = vpop.xlane.xlu0 %107 }
 0x174   :  { %v110_v16 = vmul.f32 0.125, %v108_v15  ;;  %v113_v17 = vmul.f32 %v111_v14, %v111_v14 }
 0x176   :  { %v112_v18 = vsub.f32 %v181_v8, %v110_v16  ;;  %v115_v19 = vsel %vm102_vm1, %v113_v17, 0.0 }
 0x177   :  { %116 = vadd.xlane.f32.xlu1 %v115_v19 }
 0x178   :  { %v114_v20 = vmul.f32 %v112_v18, %v112_v18 }
 0x17a   :  { %v118_v21 = vsel %vm102_vm1, %v114_v20, 0.0 }
 0x17b   :  { %119 = vadd.xlane.f32.xlu1 %v118_v21 }
 0x204   :  { %v117_v23 = vpop.xlane.xlu1 %116 }
 0x205   :  { %v121_v24 = vmul.f32 0.125, %v117_v23 }
 0x207   :  { %v125_v25 = vadd.f32 1e-05, %v121_v24 }
 0x208   :  { %v120_v26 = vpop.xlane.xlu1 %119 }
 0x209   :  { %196 = vrsqrt.f32 %v125_v25  ;;  %v122_v27 = vmul.f32 0.125, %v120_v26 }
 0x20b   :  { %v126_v28 = vadd.f32 1e-05, %v122_v27 }
 0x20d   :  { %198 = vrsqrt.f32 %v126_v28 }
 0x213   :  { %v197_v30 = vpop.eup %196 }
 0x214   :  { %v129_v31 = vmul.f32 %v197_v30, %v123_v29 }
 0x216   :  { %133 = vperm.xlu0 %192, %v129_v31  }
 0x217   :  { %v199_v33 = vpop.eup %198 }
 0x218   :  { %v130_v34 = vmul.f32 %v199_v33, %v124_v32 }
 0x21a   :  { %138 = vperm.xlu1 %193, %v130_v34   ;;  %195 = vset.pattern.permute.xlu0 %v201_v35 }
 0x21e   :  { %194 = vset.pattern.permute.xlu1 %v201_v35 }
 0x21f   :  { %145 = vperm.xlu1 %194, %v123_v29  }
 0x223   :  { %150 = vperm.xlu1 %194, %v124_v32  }
 0x295   :  { %v134_v37 = vpop.permute.xlu0 %133 }
 0x296   :  { %v141_v38 = vmul.f32 %v134_v37, %v111_v14 }
 0x299   :  { %v139_v36 = vpop.permute.xlu1 %138 }
 0x29a   :  { %v142_v41 = vmul.f32 %v139_v36, %v112_v18 }
 0x29e   :  { %v146_v39 = vpop.permute.xlu1 %145 }
 0x29f   :  { %v153_v40 = vadd.f32 %v146_v39, %v141_v38 }
 0x2a1   :  { %v155_v42 = vmax.f32 %v153_v40, 0.0 }
 0x2a2   :  { %v151_v43 = vpop.permute.xlu1 %150 }
 0x2a3   :  { %157 = vst.msk [vmem:[%s261_s3] sm:$0xff] %vm102_vm1, %v155_v42  ;;  %v154_v44 = vadd.f32 %v151_v43, %v142_v41 }
 0x2a5   :  { %v156_v45 = vmax.f32 %v154_v44, 0.0 }
 0x2a7   :  { %158 = vst.msk [vmem:[%s261_s3 + $0x8] sm:$0xff] %vm102_vm1, %v156_v45 }

// kernel: dae_forward.12
= control target key start
LH: loop header
LB: loop body
LE: loop exit
PB: predicated region body
PF: predicated region fallthrough
CT: control target
= control target key end

     0   :  { %vm26_vm0 = vcmask 523264   ;;  %vm124_vm1 = vcmask 15360   ;;  %v319_v44 = vmov 0   ;;  %v320_v63 = vmov 1   ;;  %s437_s1 = inlined_call_operand.vmem [shape: f32[64,2], index: 1, kind: input, shape index: {}]   ;;  %s438_s0 = inlined_call_operand.vmem [shape: f32[32,64], index: 0, kind: input, shape index: {}]   ;;  %s439_s2 = inlined_call_operand.vmem [shape: f32[32,2], index: 2, kind: input, shape index: {}]   ;;  %s440_s3 = inlined_call_operand.vmem [shape: f32[32,2], index: 3, kind: output, shape index: {}]  }
   0x1   :  { %v18_v0 = vld [vmem:[%s437_s1] sm:$0xff]  ;;  %v19_v1 = vld [vmem:[%s437_s1 + $0x8] sm:$0xff]  ;;  %v20_v2 = vld [vmem:[%s437_s1 + $0x10] sm:$0xff]  ;;  %305 = vset.pattern.permute.xlu0 %v319_v44  ;;  %306 = vset.pattern.permute.xlu1 %v319_v44 }
   0x2   :  { %v279_v3 = vpack.c.bf16 %v19_v1, %v18_v0  ;;  %v21_v4 = vld [vmem:[%s437_s1 + $0x18] sm:$0xff]  ;;  %v22_v6 = vld [vmem:[%s437_s1 + $0x20] sm:$0xff]  ;;  %v23_v7 = vld [vmem:[%s437_s1 + $0x28] sm:$0xff] }
   0x3   :  { %v283_v5 = vpack.c.bf16 %v21_v4, %v20_v2  ;;  %v14_v8 = vld [vmem:[%s438_s0] sm:$0xff]  ;;  %v16_v9 = vld [vmem:[%s438_s0 + $0x10] sm:$0xff]  ;;  %v287_v10 = vpack.c.bf16 %v23_v7, %v22_v6  ;;  %v25_v12 = vld [vmem:[%s437_s1 + $0x38] sm:$0xff] }
   0x4   :  { %280 = vmatprep.subr.bf16.mxu0 %v279_v3  ;;  %295 = vmatprep.subr.bf16.mxu1 %v279_v3  ;;  %v24_v11 = vld [vmem:[%s437_s1 + $0x30] sm:$0xff]  ;;  %v15_v14 = vld [vmem:[%s438_s0 + $0x8] sm:$0xff]  ;;  %v17_v15 = vld [vmem:[%s438_s0 + $0x18] sm:$0xff] }
   0x5   :  { %282 = vmatpush3.bf16.msra.mxu0 %v279_v3  ;;  %299 = vmatpush3.bf16.msra.mxu1 %v279_v3  ;;  %v291_v13 = vpack.c.bf16 %v25_v12, %v24_v11  ;;  %v165_v54 = vld [vmem:[%s439_s2] sm:$0xff]  ;;  %v166_v57 = vld [vmem:[%s439_s2 + $0x8] sm:$0xff]  ;;  %v168_v62 = vld [vmem:[%s439_s2 + $0x18] sm:$0xff] }
   0x6   :  { %284 = vmatprep.subr.bf16.mxu0 %v283_v5  ;;  %296 = vmatprep.subr.bf16.mxu1 %v283_v5  ;;  %v167_v3 = vld [vmem:[%s439_s2 + $0x10] sm:$0xff] }
   0x7   :  { %273 = vmatprep.mubr.msk.f32.mxu0 %vm26_vm0, %v14_v8  ;;  %276 = vmatprep.mubr.msk.f32.mxu1 %vm26_vm0, %v16_v9 }
   0x9   :  { %286 = vmatpush3.bf16.msra.mxu0 %v283_v5  ;;  %300 = vmatpush3.bf16.msra.mxu1 %v283_v5 }
   0xa   :  { %288 = vmatprep.subr.bf16.mxu0 %v287_v10  ;;  %297 = vmatprep.subr.bf16.mxu1 %v287_v10 }
   0xd   :  { %290 = vmatpush3.bf16.msra.mxu0 %v287_v10  ;;  %301 = vmatpush3.bf16.msra.mxu1 %v287_v10 }
   0xe   :  { %292 = vmatprep.subr.bf16.mxu0 %v291_v13  ;;  %298 = vmatprep.subr.bf16.mxu1 %v291_v13 }
  0x11   :  { %294 = vmatpush3.bf16.msra.mxu0 %v291_v13  ;;  %302 = vmatpush3.bf16.msra.mxu1 %v291_v13 }
  0x14   :  { %274 = vmatmul.mubr.msk.f32.vlgmr.msra.gmra.mrb[0].mxu0 %vm26_vm0, %v15_v14  ;;  %277 = vmatmul.mubr.msk.f32.vlgmr.msra.gmra.mrb[0].mxu1 %vm26_vm0, %v17_v15 }
  0xe7   :  { %v275_v16 = vpop.f32.mrb[0].mxu0  ;;  %v278_v17 = vpop.f32.mrb[0].mxu1 }
  0xe8   :  { %v105_v18 = vpop.f32.mrb[1].mxu0  ;;  %v115_v19 = vpop.f32.mrb[1].mxu1  ;;  %v134_v22 = vsel %vm124_vm1, %v278_v17, 0.0  ;;  %v128_v23 = vsel %vm124_vm1, %v275_v16, 0.0 }
  0xe9   :  { %v131_v20 = vsel %vm124_vm1, %v115_v19, 0.0  ;;  %v125_v21 = vsel %vm124_vm1, %v105_v18, 0.0 }
  0xea   :  { %132 = vadd.xlane.f32.xlu1 %v131_v20  ;;  %126 = vadd.xlane.f32.xlu0 %v125_v21 }
  0xee   :  { %135 = vadd.xlane.f32.xlu1 %v134_v22  ;;  %129 = vadd.xlane.f32.xlu0 %v128_v23 }
 0x177   :  { %v133_v24 = vpop.xlane.xlu1 %132  ;;  %v127_v25 = vpop.xlane.xlu0 %126 }
 0x178   :  { %v139_v26 = vmul.f32 0.5, %v133_v24  ;;  %v137_v27 = vmul.f32 0.5, %v127_v25 }
 0x17a   :  { %v385_v28 = vsub.f32 %v115_v19, %v139_v26  ;;  %v387_v29 = vsub.f32 %v105_v18, %v137_v27 }
 0x17b   :  { %v136_v30 = vpop.xlane.xlu1 %135  ;;  %v130_v31 = vpop.xlane.xlu0 %129 }
 0x17c   :  { %v140_v32 = vmul.f32 0.5, %v136_v30  ;;  %v138_v33 = vmul.f32 0.5, %v130_v31  ;;  %v145_v34 = vmul.f32 %v387_v29, %v387_v29  ;;  %v147_v38 = vmul.f32 %v385_v28, %v385_v28 }
 0x17e   :  { %v391_v35 = vsub.f32 %v278_v17, %v140_v32  ;;  %v393_v36 = vsub.f32 %v275_v16, %v138_v33  ;;  %v149_v37 = vsel %vm124_vm1, %v145_v34, 0.0  ;;  %v155_v40 = vsel %vm124_vm1, %v147_v38, 0.0 }
 0x17f   :  { %150 = vadd.xlane.f32.xlu0 %v149_v37 }
 0x180   :  { %v146_v39 = vmul.f32 %v393_v36, %v393_v36  ;;  %v148_v42 = vmul.f32 %v391_v35, %v391_v35 }
 0x182   :  { %v152_v41 = vsel %vm124_vm1, %v146_v39, 0.0  ;;  %v158_v43 = vsel %vm124_vm1, %v148_v42, 0.0 }
 0x183   :  { %156 = vadd.xlane.f32.xlu0 %v155_v40  ;;  %153 = vadd.xlane.f32.xlu1 %v152_v41 }
 0x187   :  { %159 = vadd.xlane.f32.xlu1 %v158_v43 }
 0x20c   :  { %v151_v45 = vpop.xlane.xlu0 %150 }
 0x20d   :  { %v161_v46 = vmul.f32 0.5, %v151_v45 }
 0x20f   :  { %v169_v47 = vadd.f32 1e-05, %v161_v46 }
 0x210   :  { %v154_v48 = vpop.xlane.xlu1 %153  ;;  %v157_v58 = vpop.xlane.xlu0 %156 }
 0x211   :  { %311 = vrsqrt.f32 %v169_v47  ;;  %v162_v49 = vmul.f32 0.5, %v154_v48  ;;  %v163_v61 = vmul.f32 0.5, %v157_v58 }
 0x213   :  { %v170_v50 = vadd.f32 1e-05, %v162_v49  ;;  %v171_v2 = vadd.f32 1e-05, %v163_v61 }
 0x214   :  { %v160_v51 = vpop.xlane.xlu1 %159 }
 0x215   :  { %313 = vrsqrt.f32 %v170_v50  ;;  %v164_v52 = vmul.f32 0.5, %v160_v51 }
 0x217   :  { %v172_v53 = vadd.f32 1e-05, %v164_v52 }
 0x219   :  { %315 = vrsqrt.f32 %v172_v53 }
 0x21a   :  { %317 = vrsqrt.f32 %v171_v2 }
 0x21b   :  { %v312_v55 = vpop.eup %311 }
 0x21c   :  { %v177_v56 = vmul.f32 %v312_v55, %v165_v54 }
 0x21e   :  { %183 = vperm.xlu0 %305, %v177_v56  }
 0x21f   :  { %v314_v59 = vpop.eup %313 }
 0x220   :  { %v178_v60 = vmul.f32 %v314_v59, %v166_v57 }
 0x222   :  { %188 = vperm.xlu1 %306, %v178_v60   ;;  %310 = vset.pattern.permute.xlu0 %v320_v63 }
 0x223   :  { %v316_v0 = vpop.eup %315 }
 0x224   :  { %v180_v1 = vmul.f32 %v316_v0, %v168_v62  ;;  %v318_v4 = vpop.eup %317 }
 0x225   :  { %v179_v5 = vmul.f32 %v318_v4, %v167_v3 }
 0x226   :  { %198 = vperm.xlu1 %306, %v180_v1  }
 0x22a   :  { %307 = vset.pattern.permute.xlu1 %v320_v63 }
 0x22b   :  { %207 = vperm.xlu1 %307, %v165_v54  }
 0x22f   :  { %212 = vperm.xlu1 %307, %v166_v57  }
 0x233   :  { %217 = vperm.xlu1 %307, %v167_v3  }
 0x237   :  { %308 = vset.pattern.permute.xlu1 %v319_v44 }
 0x238   :  { %193 = vperm.xlu1 %308, %v179_v5  }
 0x23c   :  { %309 = vset.pattern.permute.xlu1 %v320_v63 }
 0x23d   :  { %222 = vperm.xlu1 %309, %v168_v62  }
 0x29d   :  { %v184_v8 = vpop.permute.xlu0 %183 }
 0x29e   :  { %v201_v9 = vmul.f32 %v184_v8, %v387_v29 }
 0x2a1   :  { %v189_v6 = vpop.permute.xlu1 %188 }
 0x2a2   :  { %v202_v12 = vmul.f32 %v189_v6, %v393_v36 }
 0x2a5   :  { %v199_v7 = vpop.permute.xlu1 %198 }
 0x2a6   :  { %v204_v21 = vmul.f32 %v199_v7, %v391_v35 }
 0x2aa   :  { %v208_v10 = vpop.permute.xlu1 %207 }
 0x2ab   :  { %v225_v11 = vadd.f32 %v208_v10, %v201_v9 }
 0x2ad   :  { %v229_v13 = vmax.f32 %v225_v11, 0.0 }
 0x2ae   :  { %v213_v14 = vpop.permute.xlu1 %212 }
 0x2af   :  { %233 = vst.msk [vmem:[%s440_s3] sm:$0xff] %vm124_vm1, %v229_v13  ;;  %v226_v15 = vadd.f32 %v213_v14, %v202_v12 }
 0x2b1   :  { %v230_v16 = vmax.f32 %v226_v15, 0.0 }
 0x2b2   :  { %v218_v17 = vpop.permute.xlu1 %217 }
 0x2b3   :  { %234 = vst.msk [vmem:[%s440_s3 + $0x8] sm:$0xff] %vm124_vm1, %v230_v16 }
 0x2b7   :  { %v194_v18 = vpop.permute.xlu1 %193 }
 0x2b8   :  { %v203_v19 = vmul.f32 %v194_v18, %v385_v28 }
 0x2ba   :  { %v227_v20 = vadd.f32 %v218_v17, %v203_v19 }
 0x2bc   :  { %v231_v22 = vmax.f32 %v227_v20, 0.0  ;;  %v223_v23 = vpop.permute.xlu1 %222 }
 0x2bd   :  { %v228_v24 = vadd.f32 %v223_v23, %v204_v21 }
 0x2be   :  { %235 = vst.msk [vmem:[%s440_s3 + $0x10] sm:$0xff] %vm124_vm1, %v231_v22 }
 0x2bf   :  { %v232_v25 = vmax.f32 %v228_v24, 0.0 }
 0x2c1   :  { %236 = vst.msk [vmem:[%s440_s3 + $0x18] sm:$0xff] %vm124_vm1, %v232_v25 }

// kernel: dae_forward.13
= control target key start
LH: loop header
LB: loop body
LE: loop exit
PB: predicated region body
PF: predicated region fallthrough
CT: control target
= control target key end

     0   :  { %vm119_vm0 = vcmask 64512   ;;  %v358_v56 = vmov 0   ;;  %s496_s1 = inlined_call_operand.vmem [shape: f32[128,8], index: 1, kind: input, shape index: {}]   ;;  %s497_s0 = inlined_call_operand.vmem [shape: f32[32,128], index: 0, kind: input, shape index: {}]   ;;  %s498_s2 = inlined_call_operand.vmem [shape: f32[32,2], index: 2, kind: input, shape index: {}]   ;;  %s499_s3 = inlined_call_operand.vmem [shape: f32[32,8], index: 3, kind: output, shape index: {}]  }
   0x1   :  { %v18_v0 = vld [vmem:[%s496_s1] sm:$0xff]  ;;  %v19_v1 = vld [vmem:[%s496_s1 + $0x8] sm:$0xff]  ;;  %v20_v2 = vld [vmem:[%s496_s1 + $0x10] sm:$0xff]  ;;  %344 = vset.pattern.permute.xlu0 %v358_v56  ;;  %345 = vset.pattern.permute.xlu1 %v358_v56 }
   0x2   :  { %v294_v3 = vpack.c.bf16 %v19_v1, %v18_v0  ;;  %v21_v4 = vld [vmem:[%s496_s1 + $0x18] sm:$0xff]  ;;  %v22_v6 = vld [vmem:[%s496_s1 + $0x20] sm:$0xff]  ;;  %v23_v7 = vld [vmem:[%s496_s1 + $0x28] sm:$0xff] }
   0x3   :  { %v298_v5 = vpack.c.bf16 %v21_v4, %v20_v2  ;;  %v302_v8 = vpack.c.bf16 %v23_v7, %v22_v6  ;;  %v14_v9 = vld [vmem:[%s497_s0] sm:$0xff]  ;;  %v16_v10 = vld [vmem:[%s497_s0 + $0x10] sm:$0xff]  ;;  %v25_v12 = vld [vmem:[%s496_s1 + $0x38] sm:$0xff] }
   0x4   :  { %295 = vmatprep.subr.bf16.mxu0 %v294_v3  ;;  %326 = vmatprep.subr.bf16.mxu1 %v294_v3  ;;  %v24_v11 = vld [vmem:[%s496_s1 + $0x30] sm:$0xff]  ;;  %v26_v14 = vld [vmem:[%s496_s1 + $0x40] sm:$0xff]  ;;  %v27_v15 = vld [vmem:[%s496_s1 + $0x48] sm:$0xff] }
   0x5   :  { %297 = vmatpush3.bf16.msra.mxu0 %v294_v3  ;;  %334 = vmatpush3.bf16.msra.mxu1 %v294_v3  ;;  %v306_v13 = vpack.c.bf16 %v25_v12, %v24_v11  ;;  %v310_v16 = vpack.c.bf16 %v27_v15, %v26_v14  ;;  %v28_v17 = vld [vmem:[%s496_s1 + $0x50] sm:$0xff]  ;;  %v29_v18 = vld [vmem:[%s496_s1 + $0x58] sm:$0xff]  ;;  %v30_v20 = vld [vmem:[%s496_s1 + $0x60] sm:$0xff]  ;;  %v359_v11 = vmov 1  }
   0x6   :  { %299 = vmatprep.subr.bf16.mxu0 %v298_v5  ;;  %327 = vmatprep.subr.bf16.mxu1 %v298_v5  ;;  %v314_v19 = vpack.c.bf16 %v29_v18, %v28_v17  ;;  %v31_v21 = vld [vmem:[%s496_s1 + $0x68] sm:$0xff]  ;;  %v32_v23 = vld [vmem:[%s496_s1 + $0x70] sm:$0xff]  ;;  %v33_v24 = vld [vmem:[%s496_s1 + $0x78] sm:$0xff] }
   0x7   :  { %288 = vmatprep.mubr.f32.mxu0 %v14_v9  ;;  %291 = vmatprep.mubr.f32.mxu1 %v16_v10  ;;  %v318_v22 = vpack.c.bf16 %v31_v21, %v30_v20  ;;  %v322_v25 = vpack.c.bf16 %v33_v24, %v32_v23  ;;  %v15_v26 = vld [vmem:[%s497_s0 + $0x8] sm:$0xff]  ;;  %v17_v27 = vld [vmem:[%s497_s0 + $0x18] sm:$0xff]  ;;  %v160_v2 = vld [vmem:[%s498_s2] sm:$0xff] }
   0x8   :  { %v163_v10 = vld [vmem:[%s498_s2 + $0x18] sm:$0xff]  ;;  %v162_v15 = vld [vmem:[%s498_s2 + $0x10] sm:$0xff] }
   0x9   :  { %301 = vmatpush3.bf16.msra.mxu0 %v298_v5  ;;  %335 = vmatpush3.bf16.msra.mxu1 %v298_v5  ;;  %v161_v5 = vld [vmem:[%s498_s2 + $0x8] sm:$0xff] }
   0xa   :  { %303 = vmatprep.subr.bf16.mxu0 %v302_v8  ;;  %328 = vmatprep.subr.bf16.mxu1 %v302_v8 }
   0xd   :  { %305 = vmatpush3.bf16.msra.mxu0 %v302_v8  ;;  %336 = vmatpush3.bf16.msra.mxu1 %v302_v8 }
   0xe   :  { %307 = vmatprep.subr.bf16.mxu0 %v306_v13  ;;  %329 = vmatprep.subr.bf16.mxu1 %v306_v13 }
  0x11   :  { %309 = vmatpush3.bf16.msra.mxu0 %v306_v13  ;;  %337 = vmatpush3.bf16.msra.mxu1 %v306_v13 }
  0x12   :  { %311 = vmatprep.subr.bf16.mxu0 %v310_v16  ;;  %330 = vmatprep.subr.bf16.mxu1 %v310_v16 }
  0x15   :  { %313 = vmatpush3.bf16.msra.mxu0 %v310_v16  ;;  %338 = vmatpush3.bf16.msra.mxu1 %v310_v16 }
  0x16   :  { %315 = vmatprep.subr.bf16.mxu0 %v314_v19  ;;  %331 = vmatprep.subr.bf16.mxu1 %v314_v19 }
  0x19   :  { %317 = vmatpush3.bf16.msra.mxu0 %v314_v19  ;;  %339 = vmatpush3.bf16.msra.mxu1 %v314_v19 }
  0x1a   :  { %319 = vmatprep.subr.bf16.mxu0 %v318_v22  ;;  %332 = vmatprep.subr.bf16.mxu1 %v318_v22 }
  0x1d   :  { %321 = vmatpush3.bf16.msra.mxu0 %v318_v22  ;;  %340 = vmatpush3.bf16.msra.mxu1 %v318_v22 }
  0x1e   :  { %323 = vmatprep.subr.bf16.mxu0 %v322_v25  ;;  %333 = vmatprep.subr.bf16.mxu1 %v322_v25 }
  0x21   :  { %325 = vmatpush3.bf16.msra.mxu0 %v322_v25  ;;  %341 = vmatpush3.bf16.msra.mxu1 %v322_v25 }
  0x24   :  { %289 = vmatmul.mubr.f32.vlgmr.msra.gmra.mrb[0].mxu0 %v15_v26  ;;  %292 = vmatmul.mubr.f32.vlgmr.msra.gmra.mrb[0].mxu1 %v17_v27 }
  0xf7   :  { %v290_v28 = vpop.f32.mrb[0].mxu0  ;;  %v293_v29 = vpop.f32.mrb[0].mxu1 }
  0xf8   :  { %v100_v30 = vpop.f32.mrb[1].mxu0  ;;  %v110_v31 = vpop.f32.mrb[1].mxu1  ;;  %v129_v34 = vsel %vm119_vm0, %v293_v29, 0.0  ;;  %v123_v35 = vsel %vm119_vm0, %v290_v28, 0.0 }
  0xf9   :  { %v126_v32 = vsel %vm119_vm0, %v110_v31, 0.0  ;;  %v120_v33 = vsel %vm119_vm0, %v100_v30, 0.0 }
  0xfa   :  { %127 = vadd.xlane.f32.xlu1 %v126_v32  ;;  %121 = vadd.xlane.f32.xlu0 %v120_v33 }
  0xfe   :  { %130 = vadd.xlane.f32.xlu1 %v129_v34  ;;  %124 = vadd.xlane.f32.xlu0 %v123_v35 }
 0x187   :  { %v128_v36 = vpop.xlane.xlu1 %127  ;;  %v122_v37 = vpop.xlane.xlu0 %121 }
 0x188   :  { %v134_v38 = vmul.f32 0.125, %v128_v36  ;;  %v132_v39 = vmul.f32 0.125, %v122_v37 }
 0x18a   :  { %v444_v40 = vsub.f32 %v110_v31, %v134_v38  ;;  %v446_v41 = vsub.f32 %v100_v30, %v132_v39 }
 0x18b   :  { %v131_v42 = vpop.xlane.xlu1 %130  ;;  %v125_v43 = vpop.xlane.xlu0 %124 }
 0x18c   :  { %v135_v44 = vmul.f32 0.125, %v131_v42  ;;  %v133_v45 = vmul.f32 0.125, %v125_v43  ;;  %v140_v46 = vmul.f32 %v446_v41, %v446_v41  ;;  %v142_v50 = vmul.f32 %v444_v40, %v444_v40 }
 0x18e   :  { %v450_v47 = vsub.f32 %v293_v29, %v135_v44  ;;  %v452_v48 = vsub.f32 %v290_v28, %v133_v45  ;;  %v144_v49 = vsel %vm119_vm0, %v140_v46, 0.0  ;;  %v150_v52 = vsel %vm119_vm0, %v142_v50, 0.0 }
 0x18f   :  { %145 = vadd.xlane.f32.xlu0 %v144_v49 }
 0x190   :  { %v141_v51 = vmul.f32 %v452_v48, %v452_v48  ;;  %v143_v54 = vmul.f32 %v450_v47, %v450_v47 }
 0x192   :  { %v147_v53 = vsel %vm119_vm0, %v141_v51, 0.0  ;;  %v153_v55 = vsel %vm119_vm0, %v143_v54, 0.0 }
 0x193   :  { %151 = vadd.xlane.f32.xlu0 %v150_v52  ;;  %148 = vadd.xlane.f32.xlu1 %v147_v53 }
 0x197   :  { %154 = vadd.xlane.f32.xlu1 %v153_v55 }
 0x21c   :  { %v146_v57 = vpop.xlane.xlu0 %145 }
 0x21d   :  { %v156_v58 = vmul.f32 0.125, %v146_v57 }
 0x21f   :  { %v164_v59 = vadd.f32 1e-05, %v156_v58 }
 0x220   :  { %v149_v60 = vpop.xlane.xlu1 %148  ;;  %v152_v6 = vpop.xlane.xlu0 %151 }
 0x221   :  { %350 = vrsqrt.f32 %v164_v59  ;;  %v157_v61 = vmul.f32 0.125, %v149_v60  ;;  %v158_v9 = vmul.f32 0.125, %v152_v6 }
 0x223   :  { %v165_v62 = vadd.f32 1e-05, %v157_v61  ;;  %v166_v14 = vadd.f32 1e-05, %v158_v9 }
 0x224   :  { %v155_v63 = vpop.xlane.xlu1 %154 }
 0x225   :  { %352 = vrsqrt.f32 %v165_v62  ;;  %v159_v0 = vmul.f32 0.125, %v155_v63 }
 0x227   :  { %v167_v1 = vadd.f32 1e-05, %v159_v0 }
 0x229   :  { %354 = vrsqrt.f32 %v167_v1 }
 0x22a   :  { %356 = vrsqrt.f32 %v166_v14 }
 0x22b   :  { %v351_v3 = vpop.eup %350 }
 0x22c   :  { %v172_v4 = vmul.f32 %v351_v3, %v160_v2 }
 0x22e   :  { %178 = vperm.xlu0 %344, %v172_v4  }
 0x22f   :  { %v353_v7 = vpop.eup %352 }
 0x230   :  { %v173_v8 = vmul.f32 %v353_v7, %v161_v5 }
 0x232   :  { %183 = vperm.xlu1 %345, %v173_v8   ;;  %349 = vset.pattern.permute.xlu0 %v359_v11 }
 0x233   :  { %v355_v12 = vpop.eup %354 }
 0x234   :  { %v175_v13 = vmul.f32 %v355_v12, %v163_v10  ;;  %v357_v16 = vpop.eup %356 }
 0x235   :  { %v174_v17 = vmul.f32 %v357_v16, %v162_v15 }
 0x236   :  { %193 = vperm.xlu1 %345, %v175_v13  }
 0x23a   :  { %346 = vset.pattern.permute.xlu1 %v359_v11 }
 0x23b   :  { %202 = vperm.xlu1 %346, %v160_v2  }
 0x23f   :  { %207 = vperm.xlu1 %346, %v161_v5  }
 0x243   :  { %212 = vperm.xlu1 %346, %v162_v15  }
 0x247   :  { %347 = vset.pattern.permute.xlu1 %v358_v56 }
 0x248   :  { %188 = vperm.xlu1 %347, %v174_v17  }
 0x24c   :  { %348 = vset.pattern.permute.xlu1 %v359_v11 }
 0x24d   :  { %217 = vperm.xlu1 %348, %v163_v10  }
 0x2ad   :  { %v179_v20 = vpop.permute.xlu0 %178 }
 0x2ae   :  { %v196_v21 = vmul.f32 %v179_v20, %v446_v41 }
 0x2b1   :  { %v184_v18 = vpop.permute.xlu1 %183 }
 0x2b2   :  { %v197_v24 = vmul.f32 %v184_v18, %v452_v48 }
 0x2b5   :  { %v194_v19 = vpop.permute.xlu1 %193 }
 0x2b6   :  { %v199_v33 = vmul.f32 %v194_v19, %v450_v47 }
 0x2ba   :  { %v203_v22 = vpop.permute.xlu1 %202 }
 0x2bb   :  { %v220_v23 = vadd.f32 %v203_v22, %v196_v21 }
 0x2bd   :  { %v224_v25 = vmax.f32 %v220_v23, 0.0 }
 0x2be   :  { %v208_v26 = vpop.permute.xlu1 %207 }
 0x2bf   :  { %228 = vst.msk [vmem:[%s499_s3] sm:$0xff] %vm119_vm0, %v224_v25  ;;  %v221_v27 = vadd.f32 %v208_v26, %v197_v24 }
 0x2c1   :  { %v225_v28 = vmax.f32 %v221_v27, 0.0 }
 0x2c2   :  { %v213_v29 = vpop.permute.xlu1 %212 }
 0x2c3   :  { %229 = vst.msk [vmem:[%s499_s3 + $0x8] sm:$0xff] %vm119_vm0, %v225_v28 }
 0x2c7   :  { %v189_v30 = vpop.permute.xlu1 %188 }
 0x2c8   :  { %v198_v31 = vmul.f32 %v189_v30, %v444_v40 }
 0x2ca   :  { %v222_v32 = vadd.f32 %v213_v29, %v198_v31 }
 0x2cc   :  { %v226_v34 = vmax.f32 %v222_v32, 0.0  ;;  %v218_v35 = vpop.permute.xlu1 %217 }
 0x2cd   :  { %v223_v36 = vadd.f32 %v218_v35, %v199_v33 }
 0x2ce   :  { %230 = vst.msk [vmem:[%s499_s3 + $0x10] sm:$0xff] %vm119_vm0, %v226_v34 }
 0x2cf   :  { %v227_v37 = vmax.f32 %v223_v36, 0.0 }
 0x2d1   :  { %231 = vst.msk [vmem:[%s499_s3 + $0x18] sm:$0xff] %vm119_vm0, %v227_v37 }

// kernel: dae_forward.14
= control target key start
LH: loop header
LB: loop body
LE: loop exit
PB: predicated region body
PF: predicated region fallthrough
CT: control target
= control target key end

     0   :  { %vm107_vm0 = vcmask 146432   ;;  %v263_v40 = vmov 0   ;;  %v264_v53 = vmov 1   ;;  %s357_s1 = inlined_call_operand.vmem [shape: f32[128,18], index: 1, kind: input, shape index: {}]   ;;  %s358_s0 = inlined_call_operand.vmem [shape: f32[16,128], index: 0, kind: input, shape index: {}]   ;;  %s359_s2 = inlined_call_operand.vmem [shape: f32[16,2], index: 2, kind: input, shape index: {}]   ;;  %s360_s3 = inlined_call_operand.vmem [shape: f32[16,18], index: 3, kind: output, shape index: {}]  }
   0x1   :  { %v16_v0 = vld [vmem:[%s357_s1] sm:$0xff]  ;;  %v17_v1 = vld [vmem:[%s357_s1 + $0x8] sm:$0xff]  ;;  %v18_v2 = vld [vmem:[%s357_s1 + $0x10] sm:$0xff]  ;;  %255 = vset.pattern.permute.xlu0 %v263_v40  ;;  %256 = vset.pattern.permute.xlu1 %v263_v40 }
   0x2   :  { %v221_v3 = vpack.c.bf16 %v17_v1, %v16_v0  ;;  %v19_v4 = vld [vmem:[%s357_s1 + $0x18] sm:$0xff]  ;;  %v20_v6 = vld [vmem:[%s357_s1 + $0x20] sm:$0xff]  ;;  %v21_v7 = vld [vmem:[%s357_s1 + $0x28] sm:$0xff] }
   0x3   :  { %v225_v5 = vpack.c.bf16 %v19_v4, %v18_v2  ;;  %v229_v8 = vpack.c.bf16 %v21_v7, %v20_v6  ;;  %v14_v9 = vld [vmem:[%s358_s0] sm:$0xff]  ;;  %v22_v10 = vld [vmem:[%s357_s1 + $0x30] sm:$0xff]  ;;  %v23_v11 = vld [vmem:[%s357_s1 + $0x38] sm:$0xff] }
   0x4   :  { %222 = vmatprep.subr.bf16.mxu0 %v221_v3  ;;  %218 = vmatprep.mubr.f32.mxu0 %v14_v9  ;;  %v233_v12 = vpack.c.bf16 %v23_v11, %v22_v10  ;;  %v24_v13 = vld [vmem:[%s357_s1 + $0x40] sm:$0xff]  ;;  %v25_v14 = vld [vmem:[%s357_s1 + $0x48] sm:$0xff]  ;;  %v26_v16 = vld [vmem:[%s357_s1 + $0x50] sm:$0xff] }
   0x5   :  { %224 = vmatpush3.bf16.msra.mxu0 %v221_v3  ;;  %v237_v15 = vpack.c.bf16 %v25_v14, %v24_v13  ;;  %v27_v17 = vld [vmem:[%s357_s1 + $0x58] sm:$0xff]  ;;  %v28_v19 = vld [vmem:[%s357_s1 + $0x60] sm:$0xff]  ;;  %v29_v20 = vld [vmem:[%s357_s1 + $0x68] sm:$0xff] }
   0x6   :  { %226 = vmatprep.subr.bf16.mxu0 %v225_v5  ;;  %v241_v18 = vpack.c.bf16 %v27_v17, %v26_v16  ;;  %v245_v21 = vpack.c.bf16 %v29_v20, %v28_v19  ;;  %v30_v22 = vld [vmem:[%s357_s1 + $0x70] sm:$0xff]  ;;  %v31_v23 = vld [vmem:[%s357_s1 + $0x78] sm:$0xff]  ;;  %v15_v25 = vld [vmem:[%s358_s0 + $0x8] sm:$0xff] }
   0x7   :  { %v249_v24 = vpack.c.bf16 %v31_v23, %v30_v22  ;;  %v128_v47 = vld [vmem:[%s359_s2] sm:$0xff]  ;;  %v129_v50 = vld [vmem:[%s359_s2 + $0x8] sm:$0xff] }
   0x9   :  { %228 = vmatpush3.bf16.msra.mxu0 %v225_v5 }
   0xa   :  { %230 = vmatprep.subr.bf16.mxu0 %v229_v8 }
   0xd   :  { %232 = vmatpush3.bf16.msra.mxu0 %v229_v8 }
   0xe   :  { %234 = vmatprep.subr.bf16.mxu0 %v233_v12 }
  0x11   :  { %236 = vmatpush3.bf16.msra.mxu0 %v233_v12 }
  0x12   :  { %238 = vmatprep.subr.bf16.mxu0 %v237_v15 }
  0x15   :  { %240 = vmatpush3.bf16.msra.mxu0 %v237_v15 }
  0x16   :  { %242 = vmatprep.subr.bf16.mxu0 %v241_v18 }
  0x19   :  { %244 = vmatpush3.bf16.msra.mxu0 %v241_v18 }
  0x1a   :  { %246 = vmatprep.subr.bf16.mxu0 %v245_v21 }
  0x1d   :  { %248 = vmatpush3.bf16.msra.mxu0 %v245_v21 }
  0x1e   :  { %250 = vmatprep.subr.bf16.mxu0 %v249_v24 }
  0x21   :  { %252 = vmatpush3.bf16.msra.mxu0 %v249_v24 }
  0x24   :  { %219 = vmatmul.mubr.f32.vlgmr.msra.gmra.mrb[0].mxu0 %v15_v25 }
  0xf7   :  { %v220_v26 = vpop.f32.mrb[0].mxu0 }
  0xf8   :  { %v98_v27 = vpop.f32.mrb[1].mxu0  ;;  %v111_v29 = vsel %vm107_vm0, %v220_v26, 0.0 }
  0xf9   :  { %v108_v28 = vsel %vm107_vm0, %v98_v27, 0.0 }
  0xfa   :  { %109 = vadd.xlane.f32.xlu0 %v108_v28 }
  0xfe   :  { %112 = vadd.xlane.f32.xlu0 %v111_v29 }
 0x187   :  { %v110_v30 = vpop.xlane.xlu0 %109 }
 0x188   :  { %v114_v31 = vmul.f32 0.055555556, %v110_v30 }
 0x18a   :  { %v116_v32 = vsub.f32 %v98_v27, %v114_v31 }
 0x18b   :  { %v113_v33 = vpop.xlane.xlu0 %112 }
 0x18c   :  { %v115_v34 = vmul.f32 0.055555556, %v113_v33  ;;  %v118_v35 = vmul.f32 %v116_v32, %v116_v32 }
 0x18e   :  { %v117_v36 = vsub.f32 %v220_v26, %v115_v34  ;;  %v120_v37 = vsel %vm107_vm0, %v118_v35, 0.0 }
 0x18f   :  { %121 = vadd.xlane.f32.xlu1 %v120_v37 }
 0x190   :  { %v119_v38 = vmul.f32 %v117_v36, %v117_v36 }
 0x192   :  { %v123_v39 = vsel %vm107_vm0, %v119_v38, 0.0 }
 0x193   :  { %124 = vadd.xlane.f32.xlu1 %v123_v39 }
 0x21c   :  { %v122_v41 = vpop.xlane.xlu1 %121 }
 0x21d   :  { %v126_v42 = vmul.f32 0.055555556, %v122_v41 }
 0x21f   :  { %v130_v43 = vadd.f32 1e-05, %v126_v42 }
 0x220   :  { %v125_v44 = vpop.xlane.xlu1 %124 }
 0x221   :  { %259 = vrsqrt.f32 %v130_v43  ;;  %v127_v45 = vmul.f32 0.055555556, %v125_v44 }
 0x223   :  { %v131_v46 = vadd.f32 1e-05, %v127_v45 }
 0x225   :  { %261 = vrsqrt.f32 %v131_v46 }
 0x22b   :  { %v260_v48 = vpop.eup %259 }
 0x22c   :  { %v134_v49 = vmul.f32 %v260_v48, %v128_v47 }
 0x22e   :  { %138 = vperm.xlu0 %255, %v134_v49  }
 0x22f   :  { %v262_v51 = vpop.eup %261 }
 0x230   :  { %v135_v52 = vmul.f32 %v262_v51, %v129_v50 }
 0x232   :  { %143 = vperm.xlu1 %256, %v135_v52   ;;  %258 = vset.pattern.permute.xlu0 %v264_v53 }
 0x236   :  { %257 = vset.pattern.permute.xlu1 %v264_v53 }
 0x237   :  { %150 = vperm.xlu1 %257, %v128_v47  }
 0x23b   :  { %155 = vperm.xlu1 %257, %v129_v50  }
 0x2ad   :  { %v139_v55 = vpop.permute.xlu0 %138 }
 0x2ae   :  { %v146_v56 = vmul.f32 %v139_v55, %v116_v32 }
 0x2b1   :  { %v144_v54 = vpop.permute.xlu1 %143 }
 0x2b2   :  { %v147_v59 = vmul.f32 %v144_v54, %v117_v36 }
 0x2b6   :  { %v151_v57 = vpop.permute.xlu1 %150 }
 0x2b7   :  { %v158_v58 = vadd.f32 %v151_v57, %v146_v56 }
 0x2b9   :  { %v160_v60 = vmax.f32 %v158_v58, 0.0 }
 0x2ba   :  { %v156_v61 = vpop.permute.xlu1 %155 }
 0x2bb   :  { %162 = vst.msk [vmem:[%s360_s3] sm:$0xff] %vm107_vm0, %v160_v60  ;;  %v159_v62 = vadd.f32 %v156_v61, %v147_v59 }
 0x2bd   :  { %v161_v63 = vmax.f32 %v159_v62, 0.0 }
 0x2bf   :  { %163 = vst.msk [vmem:[%s360_s3 + $0x8] sm:$0xff] %vm107_vm0, %v161_v63 }

// kernel: dae_forward.15
= control target key start
LH: loop header
LB: loop body
LE: loop exit
PB: predicated region body
PF: predicated region fallthrough
CT: control target
= control target key end

     0   :  { %v181_v0 = vmov 0.0|0.0   ;;  %vm182_vm0 = vmmov 0   ;;  %v183_v4 = vmov 0.0   ;;  %vm23_vm1 = vcmask 523264   ;;  %s242_s1 = inlined_call_operand.vmem [shape: f32[64,50], index: 1, kind: input, shape index: {}]   ;;  %s243_s0 = inlined_call_operand.vmem [shape: f32[8,64], index: 0, kind: input, shape index: {}]   ;;  %s244_s2 = inlined_call_operand.vmem [shape: f32[8,2], index: 2, kind: input, shape index: {}]   ;;  %s245_s3 = inlined_call_operand.vmem [shape: f32[8,50], index: 3, kind: output, shape index: {}]  }
   0x1   :  { %159 = vmatprep.subr.bf16.mxu0 %v181_v0  ;;  %v15_v1 = vld [vmem:[%s242_s1] sm:$0xff]  ;;  %v16_v2 = vld [vmem:[%s242_s1 + $0x8] sm:$0xff]  ;;  %v17_v3 = vld [vmem:[%s242_s1 + $0x10] sm:$0xff]  ;;  %156 = vmatprep.mubr.msk.f32.mxu0 %vm182_vm0, %v183_v4  ;;  %vm97_vm2 = vcmask 408576   ;;  %v184_v23 = vmov 0   ;;  %v185_v24 = vmov 1  }
   0x2   :  { %v160_v5 = vpack.c.bf16 %v16_v2, %v15_v1  ;;  %v18_v6 = vld [vmem:[%s242_s1 + $0x18] sm:$0xff]  ;;  %v19_v8 = vld [vmem:[%s242_s1 + $0x20] sm:$0xff]  ;;  %v20_v9 = vld [vmem:[%s242_s1 + $0x28] sm:$0xff]  ;;  %176 = vset.pattern.permute.xlu1 %v184_v23  ;;  %178 = vset.pattern.permute.xlu0 %v185_v24 }
   0x3   :  { %v163_v7 = vpack.c.bf16 %v18_v6, %v17_v3  ;;  %v166_v10 = vpack.c.bf16 %v20_v9, %v19_v8  ;;  %v21_v11 = vld [vmem:[%s242_s1 + $0x30] sm:$0xff]  ;;  %v22_v12 = vld [vmem:[%s242_s1 + $0x38] sm:$0xff]  ;;  %v14_v14 = vld [vmem:[%s243_s0] sm:$0xff] }
   0x4   :  { %161 = vmatpush3.bf16.msra.mxu0 %v160_v5  ;;  %v169_v13 = vpack.c.bf16 %v22_v12, %v21_v11  ;;  %v108_v28 = vld [vmem:[%s244_s2] sm:$0xff] }
   0x5   :  { %162 = vmatprep.subr.bf16.mxu0 %v181_v0 }
   0x8   :  { %164 = vmatpush3.bf16.msra.mxu0 %v163_v7 }
   0x9   :  { %165 = vmatprep.subr.bf16.mxu0 %v181_v0 }
   0xc   :  { %167 = vmatpush3.bf16.msra.mxu0 %v166_v10 }
   0xd   :  { %168 = vmatprep.subr.bf16.mxu0 %v181_v0 }
  0x10   :  { %170 = vmatpush3.bf16.msra.mxu0 %v169_v13 }
  0x13   :  { %157 = vmatmul.mubr.msk.f32.vlgmr.msra.gmra.mrb[0].mxu0 %vm23_vm1, %v14_v14 }
  0xe6   :  { %v93_v15 = vpop.f32.mrb[0].mxu0 }
  0xe7   :  { %v158_v16 = vpop.f32.mrb[1].mxu0  ;;  %v98_v17 = vsel %vm97_vm2, %v93_v15, 0.0 }
  0xe8   :  { %99 = vadd.xlane.f32.xlu0 %v98_v17 }
 0x175   :  { %v100_v18 = vpop.xlane.xlu0 %99 }
 0x176   :  { %v101_v19 = vmul.f32 0.02, %v100_v18 }
 0x178   :  { %v102_v20 = vsub.f32 %v93_v15, %v101_v19 }
 0x17a   :  { %v103_v21 = vmul.f32 %v102_v20, %v102_v20 }
 0x17c   :  { %v104_v22 = vsel %vm97_vm2, %v103_v21, 0.0 }
 0x17d   :  { %105 = vadd.xlane.f32.xlu0 %v104_v22 }
 0x20a   :  { %v106_v25 = vpop.xlane.xlu0 %105 }
 0x20b   :  { %v107_v26 = vmul.f32 0.02, %v106_v25 }
 0x20d   :  { %v109_v27 = vadd.f32 1e-05, %v107_v26 }
 0x20f   :  { %179 = vrsqrt.f32 %v109_v27 }
 0x219   :  { %v180_v29 = vpop.eup %179 }
 0x21a   :  { %v111_v30 = vmul.f32 %v180_v29, %v108_v28 }
 0x21c   :  { %114 = vperm.xlu1 %176, %v111_v30  }
 0x220   :  { %177 = vset.pattern.permute.xlu1 %v185_v24 }
 0x221   :  { %120 = vperm.xlu1 %177, %v108_v28  }
 0x29b   :  { %v115_v31 = vpop.permute.xlu1 %114 }
 0x29c   :  { %v117_v32 = vmul.f32 %v115_v31, %v102_v20 }
 0x2a0   :  { %v121_v33 = vpop.permute.xlu1 %120 }
 0x2a1   :  { %v123_v34 = vadd.f32 %v121_v33, %v117_v32 }
 0x2a3   :  { %v124_v35 = vmax.f32 %v123_v34, 0.0 }
 0x2a5   :  { %125 = vst.msk [vmem:[%s245_s3] sm:$0xff] %vm97_vm2, %v124_v35 }

// kernel: dae_forward.16
= control target key start
LH: loop header
LB: loop body
LE: loop exit
PB: predicated region body
PF: predicated region fallthrough
CT: control target
= control target key end

     0   :  { %v164_v3 = vmov 0.0   ;;  %vm23_vm0 = vcmask 261120   ;;  %vm98_vm1 = vcmask 1043456   ;;  %vm100_vm2 = vcmask 273408   ;;  %s223_s1 = inlined_call_operand.vmem [shape: f32[32,162], index: 1, kind: input, shape index: {}]   ;;  %s224_s0 = inlined_call_operand.vmem [shape: f32[4,32], index: 0, kind: input, shape index: {}]   ;;  %s225_s2 = inlined_call_operand.vmem [shape: f32[4,2], index: 2, kind: input, shape index: {}]   ;;  %s226_s3 = inlined_call_operand.vmem [shape: f32[4,162], index: 3, kind: output, shape index: {}]  }
   0x1   :  { %v16_v0 = vld [vmem:[%s223_s1 + $0x8] sm:$0xff]  ;;  %v18_v1 = vld [vmem:[%s223_s1 + $0x18] sm:$0xff]  ;;  %v15_v2 = vld [vmem:[%s223_s1] sm:$0xff]  ;;  %91 = vmatprep.mubr.f32.mxu0 %v164_v3  ;;  %v165_v28 = vmov 0   ;;  %v166_v29 = vmov 1   ;;  %vm140_vm3 = vcmask 277508  }
   0x2   :  { %v148_v4 = vpack.c.bf16 %v18_v1, %v16_v0  ;;  %v17_v5 = vld [vmem:[%s223_s1 + $0x10] sm:$0xff]  ;;  %v20_v6 = vld [vmem:[%s223_s1 + $0x28] sm:$0xff]  ;;  %v22_v7 = vld [vmem:[%s223_s1 + $0x38] sm:$0xff]  ;;  %159 = vset.pattern.permute.xlu1 %v165_v28  ;;  %161 = vset.pattern.permute.xlu0 %v166_v29 }
   0x3   :  { %v150_v8 = vpack.c.bf16 %v17_v5, %v15_v2  ;;  %v152_v9 = vpack.c.bf16 %v22_v7, %v20_v6  ;;  %v19_v10 = vld [vmem:[%s223_s1 + $0x20] sm:$0xff]  ;;  %v21_v11 = vld [vmem:[%s223_s1 + $0x30] sm:$0xff]  ;;  %vm141_vm4 = vmor %vm140_vm3, %vm98_vm1 }
   0x4   :  { %149 = vmatprep.subr.bf16.mxu0 %v148_v4  ;;  %v154_v12 = vpack.c.bf16 %v21_v11, %v19_v10  ;;  %v14_v13 = vld [vmem:[%s224_s0] sm:$0xf] }
   0x5   :  { %151 = vmatpush1.bf16.msra.mxu0 %v150_v8  ;;  %v116_v33 = vld [vmem:[%s225_s2] sm:$0xf] }
   0x6   :  { %153 = vmatprep.subr.bf16.mxu0 %v152_v9 }
   0x9   :  { %155 = vmatpush1.bf16.msra.mxu0 %v154_v12 }
   0xc   :  { %147 = vmatmul.mubr.msk.f32.vlgmr.msra.gmra.mrb[0].mxu0 %vm23_vm0, %v14_v13 }
  0xdf   :  { %v93_v14 = vpop.f32.mrb[0].mxu0 }
  0xe0   :  { %v95_v15 = vpop.f32.mrb[1].mxu0  ;;  %v99_v16 = vsel %vm98_vm1, %v93_v14, 0.0 }
  0xe1   :  { %v101_v17 = vsel %vm100_vm2, %v95_v15, 0.0 }
  0xe2   :  { %v102_v18 = vadd.f32 %v101_v17, %v99_v16 }
  0xe4   :  { %103 = vadd.xlane.f32.xlu0 %v102_v18 }
 0x171   :  { %v104_v19 = vpop.xlane.xlu0 %103 }
 0x172   :  { %v105_v20 = vmul.f32 0.0061728396, %v104_v19 }
 0x174   :  { %v106_v21 = vsub.f32 %v93_v14, %v105_v20  ;;  %v107_v22 = vsub.f32 %v95_v15, %v105_v20 }
 0x176   :  { %v108_v23 = vmul.f32 %v106_v21, %v106_v21  ;;  %v109_v24 = vmul.f32 %v107_v22, %v107_v22 }
 0x178   :  { %v110_v25 = vsel %vm98_vm1, %v108_v23, 0.0  ;;  %v111_v26 = vsel %vm100_vm2, %v109_v24, 0.0 }
 0x179   :  { %v112_v27 = vadd.f32 %v111_v26, %v110_v25 }
 0x17b   :  { %113 = vadd.xlane.f32.xlu0 %v112_v27 }
 0x208   :  { %v114_v30 = vpop.xlane.xlu0 %113 }
 0x209   :  { %v115_v31 = vmul.f32 0.0061728396, %v114_v30 }
 0x20b   :  { %v117_v32 = vadd.f32 1e-05, %v115_v31 }
 0x20d   :  { %162 = vrsqrt.f32 %v117_v32 }
 0x217   :  { %v163_v34 = vpop.eup %162 }
 0x218   :  { %v119_v35 = vmul.f32 %v163_v34, %v116_v33 }
 0x21a   :  { %122 = vperm.xlu1 %159, %v119_v35  }
 0x21e   :  { %160 = vset.pattern.permute.xlu1 %v166_v29 }
 0x21f   :  { %129 = vperm.xlu1 %160, %v116_v33  }
 0x299   :  { %v123_v36 = vpop.permute.xlu1 %122 }
 0x29a   :  { %v125_v37 = vmul.f32 %v123_v36, %v106_v21  ;;  %v126_v38 = vmul.f32 %v123_v36, %v107_v22 }
 0x29e   :  { %v130_v39 = vpop.permute.xlu1 %129 }
 0x29f   :  { %v132_v40 = vadd.f32 %v130_v39, %v125_v37  ;;  %v133_v41 = vadd.f32 %v130_v39, %v126_v38 }
 0x2a1   :  { %v134_v42 = vmax.f32 %v132_v40, 0.0  ;;  %v135_v43 = vmax.f32 %v133_v41, 0.0 }
 0x2a3   :  { %v138_v44 = vcombine.low %v134_v42, %v135_v43 }
 0x2a5   :  { %142 = vst.msk [vmem:[%s226_s3] sm:$0xff] %vm141_vm4, %v138_v44 }

// kernel: dae_forward.17
= control target key start
LH: loop header
LB: loop body
LE: loop exit
PB: predicated region body
PF: predicated region fallthrough
CT: control target
= control target key end

     0   :  { %v325_v3 = vmov 0.0   ;;  %vm39_vm0 = vcmask 1043456   ;;  %vm35_vm1 = vcmask 293888   ;;  %vm194_vm2 = vcmask 1042432   ;;  %s428_s1 = inlined_call_operand.vmem [shape: f32[36,512], index: 1, kind: input, shape index: {}]   ;;  %s429_s0 = inlined_call_operand.vmem [shape: f32[3,36], index: 0, kind: input, shape index: {}]   ;;  %s430_s2 = inlined_call_operand.vmem [shape: f32[3,2], index: 2, kind: input, shape index: {}]   ;;  %s431_s3 = inlined_call_operand.vmem [shape: f32[3,512], index: 3, kind: output, shape index: {}]  }
   0x1   :  { %v16_v0 = vld [vmem:[%s428_s1 + $0x8] sm:$0xff]  ;;  %v15_v2 = vld [vmem:[%s428_s1] sm:$0xff]  ;;  %116 = vmatprep.mubr.f32.mxu0 %v325_v3  ;;  %187 = vmatprep.mubr.f32.mxu1 %v325_v3  ;;  %v18_v6 = vld [vmem:[%s428_s1 + $0x18] sm:$0xff]  ;;  %v326_v58 = vmov 0   ;;  %v327_v59 = vmov 1  }
   0x2   :  { %v20_v1 = vld [vmem:[%s428_s1 + $0x28] sm:$0xff]  ;;  %v19_v5 = vld [vmem:[%s428_s1 + $0x20] sm:$0xff]  ;;  %v22_v7 = vld [vmem:[%s428_s1 + $0x38] sm:$0xff]  ;;  %304 = vset.pattern.permute.xlu1 %v326_v58  ;;  %306 = vset.pattern.permute.xlu0 %v327_v59 }
   0x3   :  { %v285_v4 = vpack.c.bf16 %v20_v1, %v16_v0  ;;  %v287_v8 = vpack.c.bf16 %v19_v5, %v15_v2  ;;  %v293_v9 = vpack.c.bf16 %v22_v7, %v18_v6  ;;  %v17_v10 = vld [vmem:[%s428_s1 + $0x10] sm:$0xff]  ;;  %v24_v12 = vld [vmem:[%s428_s1 + $0x48] sm:$0xff]  ;;  %v23_v15 = vld [vmem:[%s428_s1 + $0x40] sm:$0xff] }
   0x4   :  { %v21_v11 = vld [vmem:[%s428_s1 + $0x30] sm:$0xff]  ;;  %v28_v14 = vld [vmem:[%s428_s1 + $0x68] sm:$0xff]  ;;  %v27_v16 = vld [vmem:[%s428_s1 + $0x60] sm:$0xff] }
   0x5   :  { %286 = vmatprep.subr.bf16.mxu0 %v285_v4  ;;  %v295_v13 = vpack.c.bf16 %v21_v11, %v17_v10  ;;  %294 = vmatprep.subr.bf16.mxu1 %v293_v9  ;;  %v289_v17 = vpack.c.bf16 %v28_v14, %v24_v12  ;;  %v291_v18 = vpack.c.bf16 %v27_v16, %v23_v15  ;;  %v26_v19 = vld [vmem:[%s428_s1 + $0x58] sm:$0xff]  ;;  %v25_v21 = vld [vmem:[%s428_s1 + $0x50] sm:$0xff]  ;;  %v32_v25 = vld [vmem:[%s428_s1 + $0x88] sm:$0xf] }
   0x6   :  { %288 = vmatpush1.bf16.msra.mxu0 %v287_v8  ;;  %v30_v20 = vld [vmem:[%s428_s1 + $0x78] sm:$0xff]  ;;  %v29_v23 = vld [vmem:[%s428_s1 + $0x70] sm:$0xff]  ;;  %v31_v27 = vld [vmem:[%s428_s1 + $0x80] sm:$0xf] }
   0x7   :  { %296 = vmatpush1.bf16.msra.mxu1 %v295_v13  ;;  %v297_v22 = vpack.c.bf16 %v30_v20, %v26_v19  ;;  %290 = vmatprep.subr.bf16.mxu0 %v289_v17  ;;  %v299_v24 = vpack.c.bf16 %v29_v23, %v25_v21  ;;  %v34_v26 = vld [vmem:[%s428_s1 + $0x98] sm:$0xf]  ;;  %v14_v28 = vld [vmem:[%s429_s0] sm:$0x7]  ;;  %v33_v29 = vld [vmem:[%s428_s1 + $0x90] sm:$0xf] }
   0x8   :  { %v223_v63 = vld [vmem:[%s430_s2] sm:$0x7] }
   0x9   :  { %298 = vmatprep.subr.bf16.mxu1 %v297_v22 }
   0xa   :  { %292 = vmatpush1.bf16.msra.mxu0 %v291_v18 }
   0xb   :  { %300 = vmatpush1.bf16.msra.mxu1 %v299_v24  ;;  %279 = vmatprep.subr.msk.mxu0 %vm39_vm0, %v32_v25 }
   0xc   :  { %282 = vmatprep.subr.msk.mxu1 %vm39_vm0, %v34_v26 }
   0xe   :  { %280 = vmatpush1.msk.msra.mxu0 %vm39_vm0, %v31_v27 }
   0xf   :  { %281 = vmatmul.mubr.msk.f32.vlgmr.msra.gmra.mrb[0].mxu0 %vm35_vm1, %v14_v28  ;;  %283 = vmatpush1.msk.msra.mxu1 %vm39_vm0, %v33_v29 }
  0x10   :  { %284 = vmatmul.mubr.msk.f32.vlgmr.msra.gmra.mrb[0].mxu1 %vm35_vm1, %v14_v28 }
  0xe2   :  { %v118_v30 = vpop.f32.mrb[0].mxu0 }
  0xe3   :  { %v195_v31 = vsel %vm194_vm2, %v118_v30, 0.0  ;;  %v120_v32 = vpop.f32.mrb[1].mxu0  ;;  %v189_v33 = vpop.f32.mrb[0].mxu1 }
  0xe4   :  { %v196_v34 = vsel %vm194_vm2, %v120_v32, 0.0  ;;  %v198_v35 = vsel %vm194_vm2, %v189_v33, 0.0  ;;  %v191_v36 = vpop.f32.mrb[1].mxu1 }
  0xe5   :  { %v197_v37 = vadd.f32 %v196_v34, %v195_v31  ;;  %v200_v39 = vsel %vm194_vm2, %v191_v36, 0.0 }
  0xe7   :  { %v199_v38 = vadd.f32 %v198_v35, %v197_v37 }
  0xe9   :  { %v201_v40 = vadd.f32 %v200_v39, %v199_v38 }
  0xeb   :  { %202 = vadd.xlane.f32.xlu0 %v201_v40 }
 0x178   :  { %v203_v41 = vpop.xlane.xlu0 %202 }
 0x179   :  { %v204_v42 = vmul.f32 0.001953125, %v203_v41 }
 0x17b   :  { %v205_v43 = vsub.f32 %v118_v30, %v204_v42  ;;  %v206_v44 = vsub.f32 %v120_v32, %v204_v42  ;;  %v207_v45 = vsub.f32 %v189_v33, %v204_v42  ;;  %v208_v46 = vsub.f32 %v191_v36, %v204_v42 }
 0x17d   :  { %v209_v47 = vmul.f32 %v205_v43, %v205_v43  ;;  %v210_v48 = vmul.f32 %v206_v44, %v206_v44  ;;  %v211_v49 = vmul.f32 %v207_v45, %v207_v45  ;;  %v212_v50 = vmul.f32 %v208_v46, %v208_v46 }
 0x17f   :  { %v213_v51 = vsel %vm194_vm2, %v209_v47, 0.0  ;;  %v214_v52 = vsel %vm194_vm2, %v210_v48, 0.0  ;;  %v216_v54 = vsel %vm194_vm2, %v211_v49, 0.0  ;;  %v218_v56 = vsel %vm194_vm2, %v212_v50, 0.0 }
 0x180   :  { %v215_v53 = vadd.f32 %v214_v52, %v213_v51 }
 0x182   :  { %v217_v55 = vadd.f32 %v216_v54, %v215_v53 }
 0x184   :  { %v219_v57 = vadd.f32 %v218_v56, %v217_v55 }
 0x186   :  { %220 = vadd.xlane.f32.xlu0 %v219_v57 }
 0x213   :  { %v221_v60 = vpop.xlane.xlu0 %220 }
 0x214   :  { %v222_v61 = vmul.f32 0.001953125, %v221_v60 }
 0x216   :  { %v224_v62 = vadd.f32 1e-05, %v222_v61 }
 0x218   :  { %307 = vrsqrt.f32 %v224_v62 }
 0x222   :  { %v308_v0 = vpop.eup %307 }
 0x223   :  { %v226_v1 = vmul.f32 %v308_v0, %v223_v63 }
 0x225   :  { %229 = vperm.xlu1 %304, %v226_v1  }
 0x229   :  { %305 = vset.pattern.permute.xlu1 %v327_v59 }
 0x22a   :  { %238 = vperm.xlu1 %305, %v223_v63  }
 0x2a4   :  { %v230_v2 = vpop.permute.xlu1 %229 }
 0x2a5   :  { %v232_v3 = vmul.f32 %v230_v2, %v205_v43  ;;  %v233_v4 = vmul.f32 %v230_v2, %v206_v44  ;;  %v234_v5 = vmul.f32 %v230_v2, %v207_v45  ;;  %v235_v6 = vmul.f32 %v230_v2, %v208_v46 }
 0x2a9   :  { %v239_v7 = vpop.permute.xlu1 %238 }
 0x2aa   :  { %v241_v8 = vadd.f32 %v239_v7, %v232_v3  ;;  %v242_v9 = vadd.f32 %v239_v7, %v233_v4  ;;  %v243_v10 = vadd.f32 %v239_v7, %v234_v5  ;;  %v244_v11 = vadd.f32 %v239_v7, %v235_v6 }
 0x2ac   :  { %v245_v12 = vsub.f32 0.0, %v241_v8  ;;  %v246_v13 = vsub.f32 0.0, %v242_v9  ;;  %v247_v14 = vsub.f32 0.0, %v243_v10  ;;  %v248_v15 = vsub.f32 0.0, %v244_v11 }
 0x2ae   :  { %v249_v16 = vmul.f32 1.442695, %v245_v12  ;;  %v251_v17 = vmul.f32 1.442695, %v246_v13  ;;  %v253_v18 = vmul.f32 1.442695, %v247_v14 }
 0x2af   :  { %v255_v19 = vmul.f32 1.442695, %v248_v15 }
 0x2b0   :  { %309 = vpow2.f32 %v249_v16 }
 0x2b1   :  { %311 = vpow2.f32 %v251_v17 }
 0x2b2   :  { %313 = vpow2.f32 %v253_v18 }
 0x2b3   :  { %315 = vpow2.f32 %v255_v19 }
 0x2ba   :  { %v310_v20 = vpop.eup %309 }
 0x2bb   :  { %v312_v21 = vpop.eup %311  ;;  %v257_v22 = vadd.f32 1.0, %v310_v20 }
 0x2bc   :  { %v314_v23 = vpop.eup %313  ;;  %v258_v24 = vadd.f32 1.0, %v312_v21 }
 0x2bd   :  { %v316_v25 = vpop.eup %315  ;;  %v259_v26 = vadd.f32 1.0, %v314_v23  ;;  %317 = vrcp.f32 %v257_v22 }
 0x2be   :  { %v260_v27 = vadd.f32 1.0, %v316_v25  ;;  %319 = vrcp.f32 %v258_v24 }
 0x2bf   :  { %321 = vrcp.f32 %v259_v26 }
 0x2c0   :  { %323 = vrcp.f32 %v260_v27 }
 0x2c7   :  { %v318_v28 = vpop.eup %317 }
 0x2c8   :  { %v320_v29 = vpop.eup %319 }
 0x2c9   :  { %v322_v30 = vpop.eup %321  ;;  %v269_v31 = vcombine.low %v318_v28, %v320_v29 }
 0x2ca   :  { %v324_v32 = vpop.eup %323 }
 0x2cb   :  { %v270_v33 = vcombine.low %v322_v30, %v324_v32  ;;  %273 = vst [vmem:[%s431_s3] sm:$0x77] %v269_v31 }
 0x2cd   :  { %274 = vst [vmem:[%s431_s3 + $0x8] sm:$0x77] %v270_v33 }

</bundles_post_ra>
